<compile_context>
chip_gen: v7x
topology: tpu7x:2x2x1
jax: 0.10.0
libtpu: 0.0.40
codegen_flags: <defaults>
</compile_context>

<pallas_src>
import functools

import jax
import jax.numpy as jnp
import numpy as np
from jax import lax
from jax.experimental import pallas as pl
from jax.experimental.pallas import tpu as pltpu


# ------------------------------ small helpers -------------------------------

def _rup(x, m):
    return ((x + m - 1) // m) * m


def _m_cap(k_cols, n_cols):
    # Keep double-buffered bf16 input tiles + resident weights + output tiles
    # comfortably under v5e's 16 MiB default scoped VMEM; v6e/v7x have more.
    return 512 if (k_cols + n_cols) <= 1536 else 256


def _tile_and_pad(m, cap=512):
    """Pick the deepest M tile (amortizes the resident MXU weight load) and,
    if M has no nice divisor, pad M up to a multiple of 128 so the tiled,
    double-buffered path is kept (never a single full-extent block)."""
    for t in (512, 256, 128):
        if t <= cap and m % t == 0:
            return t, m
    t = min(128, cap)
    return t, _rup(m, t)


def _pad_last(a, n):
    pad = n - a.shape[-1]
    if pad == 0:
        return a
    cfg = [(0, 0)] * (a.ndim - 1) + [(0, pad)]
    return jnp.pad(a, cfg)


# ----------------------------- Pallas kernels -------------------------------
# MXU matmuls in bf16 with f32 accumulation; BN affines / residual / ReLU
# epilogues in f32 on the VPU.

def _mm_bn_relu_kernel(x_ref, w_ref, s_ref, b_ref, o_ref):
    # conv1 (1x1) as (tm, Cin) @ (Cin, Cout), fused BN + ReLU, bf16 out.
    y = jnp.dot(x_ref[...], w_ref[...], preferred_element_type=jnp.float32)
    o_ref[...] = jnp.maximum(y * s_ref[...] + b_ref[...], 0.0).astype(o_ref.dtype)


def _conv3x3_acc(xr, w2_ref, Ho, Wo, row_off, col_off):
    """9 accumulated MXU matmuls over unit-stride tap windows of the (already
    halo'd and, for stride 2, parity-rearranged) bf16 tile.  No im2col tensor
    ever touches HBM; taps stay bf16 (no f32 upcast).  The per-tap
    (Ho, Wo, C) -> (Ho*Wo, C) repack is an in-VMEM relayout only."""
    C = xr.shape[-1]
    acc = None
    for dy in range(3):
        for dx in range(3):
            tap = xr[row_off[dy]:row_off[dy] + Ho,
                     col_off[dx]:col_off[dx] + Wo, :]
            tap = tap.reshape(Ho * Wo, C)
            d = jnp.dot(tap, w2_ref[3 * dy + dx],
                        preferred_element_type=jnp.float32)
            acc = d if acc is None else acc + d
    return acc


def _fused_sc_kernel(xr_ref, w2_ref, s2_ref, b2_ref, w3_ref, s3_ref, b3_ref,
                     xs_ref, wsc_ref, ssc_ref, bsc_ref, o_ref,
                     *, Ho, Wo, row_off, col_off):
    # conv2(3x3,stride) + BN2 + ReLU + conv3(1x1) + BN3
    #   + conv-shortcut(1x1,stride) + BNsc + add + ReLU, all in one kernel.
    acc = _conv3x3_acc(xr_ref[0], w2_ref, Ho, Wo, row_off, col_off)
    y2 = jnp.maximum(acc * s2_ref[...] + b2_ref[...], 0.0).astype(jnp.bfloat16)
    y3 = jnp.dot(y2, w3_ref[...], preferred_element_type=jnp.float32)
    y3 = y3 * s3_ref[...] + b3_ref[...]
    sc = jnp.dot(xs_ref[0], wsc_ref[...], preferred_element_type=jnp.float32)
    sc = sc * ssc_ref[...] + bsc_ref[...]
    o_ref[0] = jnp.maximum(y3 + sc, 0.0).astype(o_ref.dtype)


def _fused_id_kernel(xr_ref, w2_ref, s2_ref, b2_ref, w3_ref, s3_ref, b3_ref,
                     xid_ref, o_ref, *, Ho, Wo, row_off, col_off):
    # Same as above with an identity shortcut (stride 1, Cin == 4*planes).
    acc = _conv3x3_acc(xr_ref[0], w2_ref, Ho, Wo, row_off, col_off)
    y2 = jnp.maximum(acc * s2_ref[...] + b2_ref[...], 0.0).astype(jnp.bfloat16)
    y3 = jnp.dot(y2, w3_ref[...], preferred_element_type=jnp.float32)
    y3 = y3 * s3_ref[...] + b3_ref[...]
    o_ref[0] = jnp.maximum(y3 + xid_ref[0].astype(jnp.float32), 0.0).astype(o_ref.dtype)


# ------------------------------ pallas_call glue -----------------------------

def conv1x1_bn_relu(x2d, w, s, b, tm):
    """M-tiled matmul over pixels; K / Cout resident; bf16 output."""
    M, K = x2d.shape
    Co = w.shape[1]
    return pl.pallas_call(
        _mm_bn_relu_kernel,
        out_shape=jax.ShapeDtypeStruct((M, Co), jnp.bfloat16),
        grid=(M // tm,),
        in_specs=[
            pl.BlockSpec((tm, K), lambda i: (i, 0)),
            pl.BlockSpec((K, Co), lambda i: (0, 0)),
            pl.BlockSpec((1, Co), lambda i: (0, 0)),
            pl.BlockSpec((1, Co), lambda i: (0, 0)),
        ],
        out_specs=pl.BlockSpec((tm, Co), lambda i: (i, 0)),
        compiler_params=pltpu.CompilerParams(dimension_semantics=("parallel",)),
    )(x2d, w, s, b)


def fused_conv2_head(xr, w2, s2, b2, w3, s3, b3, res,
                     wsc=None, ssc=None, bsc=None,
                     *, Ho, Wo, row_off, col_off):
    """Fused conv2+BN2+ReLU+conv3+BN3+shortcut+add+ReLU.  Grid: one image per
    step (weights resident, image tile pipelined).  Output is flat
    (N, Ho*Wo, Cout_p) bf16 so no reshape is needed inside the kernel."""
    N, HR, WR, cp = xr.shape
    cout_p = w3.shape[1]
    cres = res.shape[-1]
    base_specs = [
        pl.BlockSpec((1, HR, WR, cp), lambda n: (n, 0, 0, 0)),
        pl.BlockSpec(w2.shape, lambda n: (0, 0, 0)),
        pl.BlockSpec(s2.shape, lambda n: (0, 0)),
        pl.BlockSpec(b2.shape, lambda n: (0, 0)),
        pl.BlockSpec(w3.shape, lambda n: (0, 0)),
        pl.BlockSpec(s3.shape, lambda n: (0, 0)),
        pl.BlockSpec(b3.shape, lambda n: (0, 0)),
        pl.BlockSpec((1, Ho * Wo, cres), lambda n: (n, 0, 0)),
    ]
    if wsc is not None:
        kern = functools.partial(_fused_sc_kernel, Ho=Ho, Wo=Wo,
                                 row_off=row_off, col_off=col_off)
        args = (xr, w2, s2, b2, w3, s3, b3, res, wsc, ssc, bsc)
        in_specs = base_specs + [
            pl.BlockSpec(wsc.shape, lambda n: (0, 0)),
            pl.BlockSpec(ssc.shape, lambda n: (0, 0)),
            pl.BlockSpec(bsc.shape, lambda n: (0, 0)),
        ]
    else:
        kern = functools.partial(_fused_id_kernel, Ho=Ho, Wo=Wo,
                                 row_off=row_off, col_off=col_off)
        args = (xr, w2, s2, b2, w3, s3, b3, res)
        in_specs = base_specs
    return pl.pallas_call(
        kern,
        out_shape=jax.ShapeDtypeStruct((N, Ho * Wo, cout_p), jnp.bfloat16),
        grid=(N,),
        in_specs=in_specs,
        out_specs=pl.BlockSpec((1, Ho * Wo, cout_p), lambda n: (n, 0, 0)),
        compiler_params=pltpu.CompilerParams(dimension_semantics=("parallel",)),
    )(*args)


# ------------------------------- parameter prep ------------------------------

def _fold_bn(gamma, beta, mean, var, eps=1e-5):
    scale = gamma / jnp.sqrt(var + eps)
    shift = beta - mean * scale
    return (scale.reshape(1, -1).astype(jnp.float32),
            shift.reshape(1, -1).astype(jnp.float32))


def _fold_bn_pad(gamma, beta, mean, var, c_pad, eps=1e-5):
    s, b = _fold_bn(gamma, beta, mean, var, eps)
    return _pad_last(s, c_pad), _pad_last(b, c_pad)


def _w1x1_mat(w_torch, cin_p, cout_p):
    # (Cout, Cin, 1, 1) -> (Cin_p, Cout_p), zero padded, bf16.
    w = jnp.transpose(w_torch[:, :, 0, 0], (1, 0))
    w = jnp.pad(w, ((0, cin_p - w.shape[0]), (0, cout_p - w.shape[1])))
    return w.astype(jnp.bfloat16)


def _w3x3_mat(w_torch, cin_p, cout_p):
    # (Cout, Cin, 3, 3) -> (9, Cin_p, Cout_p), zero padded, bf16.
    w = jnp.transpose(w_torch, (2, 3, 1, 0))
    w = jnp.pad(w, ((0, 0), (0, 0),
                    (0, cin_p - w.shape[2]), (0, cout_p - w.shape[3])))
    return w.reshape(9, cin_p, cout_p).astype(jnp.bfloat16)


def init_params(key, in_planes, planes, stride, expansion=4):
    ks = jax.random.split(key, 16)
    out_planes = expansion * planes

    def bn_params(k, c):
        k1, k2, k3, k4 = jax.random.split(k, 4)
        gamma = 1.0 + 0.1 * jax.random.normal(k1, (c,), jnp.float32)
        beta = 0.1 * jax.random.normal(k2, (c,), jnp.float32)
        mean = 0.1 * jax.random.normal(k3, (c,), jnp.float32)
        var = 1.0 + 0.1 * jnp.abs(jax.random.normal(k4, (c,), jnp.float32))
        return gamma, beta, mean, var

    p = {}
    p['w1_t'] = 0.2 * jax.random.normal(ks[0], (planes, in_planes, 1, 1), jnp.float32)
    p['bn1'] = bn_params(ks[1], planes)
    p['w2_t'] = 0.1 * jax.random.normal(ks[2], (planes, planes, 3, 3), jnp.float32)
    p['bn2'] = bn_params(ks[3], planes)
    p['w3_t'] = 0.2 * jax.random.normal(ks[4], (out_planes, planes, 1, 1), jnp.float32)
    p['bn3'] = bn_params(ks[5], out_planes)
    if stride != 1 or in_planes != out_planes:
        p['wsc_t'] = 0.2 * jax.random.normal(ks[6], (out_planes, in_planes, 1, 1), jnp.float32)
        p['bnsc'] = bn_params(ks[7], out_planes)
    return p


# --------------------------------- forward -----------------------------------

def bottleneck_forward(x_nchw, params, stride, planes, expansion=4):
    """x_nchw: (N, Cin, H, W) float32. Returns (N, expansion*planes, Ho, Wo) f32."""
    x = jnp.transpose(x_nchw, (0, 2, 3, 1)).astype(jnp.float32)      # NHWC
    N, H, W, Cin = x.shape
    out_planes = expansion * planes
    cin_p = _rup(Cin, 128)
    cp = _rup(planes, 128)
    cout_p = _rup(out_planes, 128)

    xb = _pad_last(x, cin_p).astype(jnp.bfloat16)                    # (N,H,W,cin_p) bf16

    # conv1 (1x1) + bn1 + relu — M-tiled matmul (M padded to a tile multiple).
    s1, b1 = _fold_bn_pad(*params['bn1'], cp)
    w1 = _w1x1_mat(params['w1_t'], cin_p, cp)
    M = N * H * W
    tm, Mp = _tile_and_pad(M, cap=_m_cap(cin_p, cp))
    x2d = xb.reshape(M, cin_p)
    if Mp != M:
        x2d = jnp.pad(x2d, ((0, Mp - M), (0, 0)))
    out1 = conv1x1_bn_relu(x2d, w1, s1, b1, tm)[:M].reshape(N, H, W, cp)

    # Halo pad (+ parity rearrange for stride 2).  The rearrange turns every
    # stride-2 3x3 tap into a unit-stride window, so the fused kernel only
    # computes the Ho*Wo strided output positions.
    # TODO(synk): fold this pad/rearrange into the kernel via a VMEM scratch.
    xp = jnp.pad(out1, ((0, 0), (1, 1), (1, 1), (0, 0)))              # (N,H+2,W+2,cp)
    Hp, Wp = H + 2, W + 2
    Ho = (H - 1) // stride + 1
    Wo = (W - 1) // stride + 1
    if stride == 1:
        xr, row_off, col_off = xp, (0, 1, 2), (0, 1, 2)
    else:
        Er, Ec = (Hp + 1) // 2, (Wp + 1) // 2
        xr = jnp.concatenate([xp[:, 0::2], xp[:, 1::2]], axis=1)      # rows: evens|odds
        xr = jnp.concatenate([xr[:, :, 0::2], xr[:, :, 1::2]], axis=2)  # cols: evens|odds
        row_off, col_off = (0, Er, 1), (0, Ec, 1)

    s2, b2 = _fold_bn_pad(*params['bn2'], cp)
    w2 = _w3x3_mat(params['w2_t'], cp, cp)
    s3, b3 = _fold_bn_pad(*params['bn3'], cout_p)
    w3 = _w1x1_mat(params['w3_t'], cp, cout_p)

    if 'wsc_t' in params:
        ssc, bsc = _fold_bn_pad(*params['bnsc'], cout_p)
        wsc = _w1x1_mat(params['wsc_t'], cin_p, cout_p)
        # TODO(synk): fold the stride-2 shortcut gather into the kernel.
        xs = xb if stride == 1 else xb[:, ::stride, ::stride, :]
        res = xs.reshape(N, Ho * Wo, cin_p)
        out = fused_conv2_head(xr, w2, s2, b2, w3, s3, b3, res, wsc, ssc, bsc,
                               Ho=Ho, Wo=Wo, row_off=row_off, col_off=col_off)
    else:
        # identity shortcut: stride == 1 and Cin == out_planes (cin_p == cout_p)
        res = xb.reshape(N, H * W, cin_p)
        out = fused_conv2_head(xr, w2, s2, b2, w3, s3, b3, res,
                               Ho=Ho, Wo=Wo, row_off=row_off, col_off=col_off)

    out = out.reshape(N, Ho, Wo, cout_p)[..., :out_planes]
    # TODO(synk): keep NHWC bf16 end-to-end when chaining blocks; this NCHW f32
    #             transpose only matches the PyTorch interface.
    return jnp.transpose(out, (0, 3, 1, 2)).astype(jnp.float32)


# ----------------------- pure-JAX reference (for check) ----------------------
# Mirrors the kernel's bf16 rounding of activations/weights so the comparison
# only measures accumulation-order / rounding-boundary differences.

def _round_bf16(a):
    return a.astype(jnp.bfloat16).astype(jnp.float32)


def _conv_ref(x_nhwc, w_torch, stride, padding):
    w_hwio = _round_bf16(jnp.transpose(w_torch, (2, 3, 1, 0)))
    return lax.conv_general_dilated(
        x_nhwc, w_hwio, window_strides=(stride, stride),
        padding=[(padding, padding), (padding, padding)],
        dimension_numbers=('NHWC', 'HWIO', 'NHWC'),
        precision=lax.Precision.HIGHEST)


def bottleneck_ref(x_nchw, params, stride, planes, expansion=4):
    x = _round_bf16(jnp.transpose(x_nchw, (0, 2, 3, 1)).astype(jnp.float32))
    s1, b1 = _fold_bn(*params['bn1'])
    out = _round_bf16(jnp.maximum(_conv_ref(x, params['w1_t'], 1, 0) * s1 + b1, 0.0))
    s2, b2 = _fold_bn(*params['bn2'])
    out = _round_bf16(jnp.maximum(_conv_ref(out, params['w2_t'], stride, 1) * s2 + b2, 0.0))
    s3, b3 = _fold_bn(*params['bn3'])
    out = _conv_ref(out, params['w3_t'], 1, 0) * s3 + b3
    if 'wsc_t' in params:
        ssc, bsc = _fold_bn(*params['bnsc'])
        sc = _conv_ref(x, params['wsc_t'], stride, 0) * ssc + bsc
    else:
        sc = x
    out = _round_bf16(jnp.maximum(out + sc, 0.0))
    return jnp.transpose(out, (0, 3, 1, 2))


# ----------------------------------- main ------------------------------------

if __name__ == "__main__":
    N, H, W = 2, 8, 8
    configs = [
        (16, 8, 1),   # channel change -> conv shortcut, stride 1
        (16, 8, 2),   # conv shortcut, stride 2 (stride folded into the kernel)
        (32, 8, 1),   # in_planes == 4*planes, stride 1 -> identity shortcut
    ]

    key = jax.random.PRNGKey(0)
    for in_planes, planes, stride in configs:
        key, kx, kp = jax.random.split(key, 3)
        x = jax.random.normal(kx, (N, in_planes, H, W), jnp.float32)   # NCHW, like PyTorch
        params = init_params(kp, in_planes, planes, stride)

        fwd = jax.jit(functools.partial(bottleneck_forward,
                                        params=params, stride=stride, planes=planes))
        out = jax.block_until_ready(fwd(x))

        ref = bottleneck_ref(x, params, stride, planes)
        Ho = (H + 2 - 3) // stride + 1
        assert out.shape == (N, 4 * planes, Ho, Ho), out.shape
        np.testing.assert_allclose(np.asarray(out), np.asarray(ref),
                                   rtol=1e-2, atol=1e-2)

    print("KERNEL_OK")
</pallas_src>

<mosaic_0001>
module attributes {stable_mosaic.version = 11 : i64} {
  func.func @_mm_bn_relu_kernel(%arg0: i32, %arg1: memref<128x128xbf16, #tpu.memory_space<vmem>>, %arg2: memref<128x128xbf16, #tpu.memory_space<vmem>>, %arg3: memref<1x128xf32, #tpu.memory_space<vmem>>, %arg4: memref<1x128xf32, #tpu.memory_space<vmem>>, %arg5: memref<128x128xbf16, #tpu.memory_space<vmem>>) attributes {dimension_semantics = [#tpu.dimension_semantics<parallel>], iteration_bounds = array<i64: 1>, scalar_prefetch = 0 : i64, scratch_operands = 0 : i64, tpu.core_type = #tpu.core_type<tc>, window_params = [{transform_indices = @transform_0, window_bounds = array<i64: 128, 128>}, {pipeline_mode = #tpu.pipeline_mode<synchronous>, transform_indices = @transform_1, window_bounds = array<i64: 128, 128>}, {pipeline_mode = #tpu.pipeline_mode<synchronous>, transform_indices = @transform_2, window_bounds = array<i64: 1, 128>}, {pipeline_mode = #tpu.pipeline_mode<synchronous>, transform_indices = @transform_3, window_bounds = array<i64: 1, 128>}, {transform_indices = @transform_4, window_bounds = array<i64: 128, 128>}]} {
    %c0 = arith.constant 0 : index
    %c0_0 = arith.constant 0 : index
    %0 = vector.load %arg1[%c0, %c0_0] : memref<128x128xbf16, #tpu.memory_space<vmem>>, vector<128x128xbf16>
    %c0_1 = arith.constant 0 : index
    %c0_2 = arith.constant 0 : index
    %1 = vector.load %arg2[%c0_1, %c0_2] : memref<128x128xbf16, #tpu.memory_space<vmem>>, vector<128x128xbf16>
    %cst = arith.constant dense<0.000000e+00> : vector<128x128xf32>
    %2 = tpu.matmul %0, %1, %cst {dimension_numbers = #tpu.dot_dimension_numbers<[1], [0], [0], [1], [0, 0, 1, 1], [], []>} : vector<128x128xbf16>, vector<128x128xbf16>, vector<128x128xf32> -> vector<128x128xf32>
    %c0_3 = arith.constant 0 : index
    %c0_4 = arith.constant 0 : index
    %3 = vector.load %arg3[%c0_3, %c0_4] : memref<1x128xf32, #tpu.memory_space<vmem>>, vector<1x128xf32>
    %4 = vector.broadcast %3 : vector<1x128xf32> to vector<128x128xf32>
    %5 = arith.mulf %2, %4 : vector<128x128xf32>
    %c0_5 = arith.constant 0 : index
    %c0_6 = arith.constant 0 : index
    %6 = vector.load %arg4[%c0_5, %c0_6] : memref<1x128xf32, #tpu.memory_space<vmem>>, vector<1x128xf32>
    %7 = vector.broadcast %6 : vector<1x128xf32> to vector<128x128xf32>
    %8 = arith.addf %5, %7 : vector<128x128xf32>
    %cst_7 = arith.constant 0.000000e+00 : f32
    %9 = vector.broadcast %cst_7 : f32 to vector<128x128xf32>
    %10 = arith.maximumf %8, %9 : vector<128x128xf32>
    %11 = arith.truncf %10 : vector<128x128xf32> to vector<128x128xbf16>
    %c0_8 = arith.constant 0 : index
    %c0_9 = arith.constant 0 : index
    %12 = vector.load %arg5[%c0_8, %c0_9] : memref<128x128xbf16, #tpu.memory_space<vmem>>, vector<128x128xbf16>
    tpu.vector_store %arg5[%c0_8, %c0_9], %11 {strides = array<i32>} : memref<128x128xbf16, #tpu.memory_space<vmem>>, vector<128x128xbf16>,
    return
  }
  func.func @transform_0(%arg0: i32) -> (i32, i32) {
    %c0_i32 = arith.constant 0 : i32
    %c0_i32_0 = arith.constant 0 : i32
    return %arg0, %c0_i32 : i32, i32
  }
  func.func @transform_1(%arg0: i32) -> (i32, i32) {
    %c0_i32 = arith.constant 0 : i32
    %c0_i32_0 = arith.constant 0 : i32
    %c0_i32_1 = arith.constant 0 : i32
    return %c0_i32, %c0_i32_0 : i32, i32
  }
  func.func @transform_2(%arg0: i32) -> (i32, i32) {
    %c0_i32 = arith.constant 0 : i32
    %c0_i32_0 = arith.constant 0 : i32
    %c0_i32_1 = arith.constant 0 : i32
    return %c0_i32, %c0_i32_0 : i32, i32
  }
  func.func @transform_3(%arg0: i32) -> (i32, i32) {
    %c0_i32 = arith.constant 0 : i32
    %c0_i32_0 = arith.constant 0 : i32
    %c0_i32_1 = arith.constant 0 : i32
    return %c0_i32, %c0_i32_0 : i32, i32
  }
  func.func @transform_4(%arg0: i32) -> (i32, i32) {
    %c0_i32 = arith.constant 0 : i32
    %c0_i32_0 = arith.constant 0 : i32
    return %arg0, %c0_i32 : i32, i32
  }
}

module attributes {stable_mosaic.version = 11 : i64} {
  func.func @_fused_sc_kernel(%arg0: i32, %arg1: memref<1x10x10x128xbf16, #tpu.memory_space<vmem>>, %arg2: memref<9x128x128xbf16, #tpu.memory_space<vmem>>, %arg3: memref<1x128xf32, #tpu.memory_space<vmem>>, %arg4: memref<1x128xf32, #tpu.memory_space<vmem>>, %arg5: memref<128x128xbf16, #tpu.memory_space<vmem>>, %arg6: memref<1x128xf32, #tpu.memory_space<vmem>>, %arg7: memref<1x128xf32, #tpu.memory_space<vmem>>, %arg8: memref<1x64x128xbf16, #tpu.memory_space<vmem>>, %arg9: memref<128x128xbf16, #tpu.memory_space<vmem>>, %arg10: memref<1x128xf32, #tpu.memory_space<vmem>>, %arg11: memref<1x128xf32, #tpu.memory_space<vmem>>, %arg12: memref<1x64x128xbf16, #tpu.memory_space<vmem>>) attributes {dimension_semantics = [#tpu.dimension_semantics<parallel>], iteration_bounds = array<i64: 2>, scalar_prefetch = 0 : i64, scratch_operands = 0 : i64, tpu.core_type = #tpu.core_type<tc>, window_params = [{transform_indices = @transform_0, window_bounds = array<i64: 1, 10, 10, 128>}, {pipeline_mode = #tpu.pipeline_mode<synchronous>, transform_indices = @transform_1, window_bounds = array<i64: 9, 128, 128>}, {pipeline_mode = #tpu.pipeline_mode<synchronous>, transform_indices = @transform_2, window_bounds = array<i64: 1, 128>}, {pipeline_mode = #tpu.pipeline_mode<synchronous>, transform_indices = @transform_3, window_bounds = array<i64: 1, 128>}, {pipeline_mode = #tpu.pipeline_mode<synchronous>, transform_indices = @transform_4, window_bounds = array<i64: 128, 128>}, {pipeline_mode = #tpu.pipeline_mode<synchronous>, transform_indices = @transform_5, window_bounds = array<i64: 1, 128>}, {pipeline_mode = #tpu.pipeline_mode<synchronous>, transform_indices = @transform_6, window_bounds = array<i64: 1, 128>}, {transform_indices = @transform_7, window_bounds = array<i64: 1, 64, 128>}, {pipeline_mode = #tpu.pipeline_mode<synchronous>, transform_indices = @transform_8, window_bounds = array<i64: 128, 128>}, {pipeline_mode = #tpu.pipeline_mode<synchronous>, transform_indices = @transform_9, window_bounds = array<i64: 1, 128>}, {pipeline_mode = #tpu.pipeline_mode<synchronous>, transform_indices = @transform_10, window_bounds = array<i64: 1, 128>}, {transform_indices = @transform_11, window_bounds = array<i64: 1, 64, 128>}]} {
    %c0 = arith.constant 0 : index
    %c0_0 = arith.constant 0 : index
    %c0_1 = arith.constant 0 : index
    %c0_2 = arith.constant 0 : index
    %0 = vector.load %arg1[%c0, %c0_0, %c0_1, %c0_2] : memref<1x10x10x128xbf16, #tpu.memory_space<vmem>>, vector<1x10x10x128xbf16>
    %1 = vector.shape_cast %0 : vector<1x10x10x128xbf16> to vector<10x10x128xbf16>
    %2 = vector.extract_strided_slice %1 {offsets = [0, 0, 0], sizes = [8, 8, 128], strides = [1, 1, 1]} : vector<10x10x128xbf16> to vector<8x8x128xbf16>
    %3 = vector.shape_cast %2 : vector<8x8x128xbf16> to vector<64x128xbf16>
    %c0_3 = arith.constant 0 : index
    %c0_4 = arith.constant 0 : index
    %c0_5 = arith.constant 0 : index
    %4 = vector.load %arg2[%c0_3, %c0_4, %c0_5] : memref<9x128x128xbf16, #tpu.memory_space<vmem>>, vector<1x128x128xbf16>
    %5 = vector.shape_cast %4 : vector<1x128x128xbf16> to vector<128x128xbf16>
    %cst = arith.constant dense<0.000000e+00> : vector<64x128xf32>
    %6 = tpu.matmul %3, %5, %cst {dimension_numbers = #tpu.dot_dimension_numbers<[1], [0], [0], [1], [0, 0, 1, 1], [], []>} : vector<64x128xbf16>, vector<128x128xbf16>, vector<64x128xf32> -> vector<64x128xf32>
    %7 = vector.extract_strided_slice %1 {offsets = [0, 1, 0], sizes = [8, 8, 128], strides = [1, 1, 1]} : vector<10x10x128xbf16> to vector<8x8x128xbf16>
    %8 = vector.shape_cast %7 : vector<8x8x128xbf16> to vector<64x128xbf16>
    %c1 = arith.constant 1 : index
    %c0_6 = arith.constant 0 : index
    %c0_7 = arith.constant 0 : index
    %9 = vector.load %arg2[%c1, %c0_6, %c0_7] : memref<9x128x128xbf16, #tpu.memory_space<vmem>>, vector<1x128x128xbf16>
    %10 = vector.shape_cast %9 : vector<1x128x128xbf16> to vector<128x128xbf16>
    %cst_8 = arith.constant dense<0.000000e+00> : vector<64x128xf32>
    %11 = tpu.matmul %8, %10, %cst_8 {dimension_numbers = #tpu.dot_dimension_numbers<[1], [0], [0], [1], [0, 0, 1, 1], [], []>} : vector<64x128xbf16>, vector<128x128xbf16>, vector<64x128xf32> -> vector<64x128xf32>
    %12 = arith.addf %6, %11 : vector<64x128xf32>
    %13 = vector.extract_strided_slice %1 {offsets = [0, 2, 0], sizes = [8, 8, 128], strides = [1, 1, 1]} : vector<10x10x128xbf16> to vector<8x8x128xbf16>
    %14 = vector.shape_cast %13 : vector<8x8x128xbf16> to vector<64x128xbf16>
    %c2 = arith.constant 2 : index
    %c0_9 = arith.constant 0 : index
    %c0_10 = arith.constant 0 : index
    %15 = vector.load %arg2[%c2, %c0_9, %c0_10] : memref<9x128x128xbf16, #tpu.memory_space<vmem>>, vector<1x128x128xbf16>
    %16 = vector.shape_cast %15 : vector<1x128x128xbf16> to vector<128x128xbf16>
    %cst_11 = arith.constant dense<0.000000e+00> : vector<64x128xf32>
    %17 = tpu.matmul %14, %16, %cst_11 {dimension_numbers = #tpu.dot_dimension_numbers<[1], [0], [0], [1], [0, 0, 1, 1], [], []>} : vector<64x128xbf16>, vector<128x128xbf16>, vector<64x128xf32> -> vector<64x128xf32>
    %18 = arith.addf %12, %17 : vector<64x128xf32>
    %19 = vector.extract_strided_slice %1 {offsets = [1, 0, 0], sizes = [8, 8, 128], strides = [1, 1, 1]} : vector<10x10x128xbf16> to vector<8x8x128xbf16>
    %20 = vector.shape_cast %19 : vector<8x8x128xbf16> to vector<64x128xbf16>
    %c3 = arith.constant 3 : index
    %c0_12 = arith.constant 0 : index
    %c0_13 = arith.constant 0 : index
    %21 = vector.load %arg2[%c3, %c0_12, %c0_13] : memref<9x128x128xbf16, #tpu.memory_space<vmem>>, vector<1x128x128xbf16>
    %22 = vector.shape_cast %21 : vector<1x128x128xbf16> to vector<128x128xbf16>
    %cst_14 = arith.constant dense<0.000000e+00> : vector<64x128xf32>
    %23 = tpu.matmul %20, %22, %cst_14 {dimension_numbers = #tpu.dot_dimension_numbers<[1], [0], [0], [1], [0, 0, 1, 1], [], []>} : vector<64x128xbf16>, vector<128x128xbf16>, vector<64x128xf32> -> vector<64x128xf32>
    %24 = arith.addf %18, %23 : vector<64x128xf32>
    %25 = vector.extract_strided_slice %1 {offsets = [1, 1, 0], sizes = [8, 8, 128], strides = [1, 1, 1]} : vector<10x10x128xbf16> to vector<8x8x128xbf16>
    %26 = vector.shape_cast %25 : vector<8x8x128xbf16> to vector<64x128xbf16>
    %c4 = arith.constant 4 : index
    %c0_15 = arith.constant 0 : index
    %c0_16 = arith.constant 0 : index
    %27 = vector.load %arg2[%c4, %c0_15, %c0_16] : memref<9x128x128xbf16, #tpu.memory_space<vmem>>, vector<1x128x128xbf16>
    %28 = vector.shape_cast %27 : vector<1x128x128xbf16> to vector<128x128xbf16>
    %cst_17 = arith.constant dense<0.000000e+00> : vector<64x128xf32>
    %29 = tpu.matmul %26, %28, %cst_17 {dimension_numbers = #tpu.dot_dimension_numbers<[1], [0], [0], [1], [0, 0, 1, 1], [], []>} : vector<64x128xbf16>, vector<128x128xbf16>, vector<64x128xf32> -> vector<64x128xf32>
    %30 = arith.addf %24, %29 : vector<64x128xf32>
    %31 = vector.extract_strided_slice %1 {offsets = [1, 2, 0], sizes = [8, 8, 128], strides = [1, 1, 1]} : vector<10x10x128xbf16> to vector<8x8x128xbf16>
    %32 = vector.shape_cast %31 : vector<8x8x128xbf16> to vector<64x128xbf16>
    %c5 = arith.constant 5 : index
    %c0_18 = arith.constant 0 : index
    %c0_19 = arith.constant 0 : index
    %33 = vector.load %arg2[%c5, %c0_18, %c0_19] : memref<9x128x128xbf16, #tpu.memory_space<vmem>>, vector<1x128x128xbf16>
    %34 = vector.shape_cast %33 : vector<1x128x128xbf16> to vector<128x128xbf16>
    %cst_20 = arith.constant dense<0.000000e+00> : vector<64x128xf32>
    %35 = tpu.matmul %32, %34, %cst_20 {dimension_numbers = #tpu.dot_dimension_numbers<[1], [0], [0], [1], [0, 0, 1, 1], [], []>} : vector<64x128xbf16>, vector<128x128xbf16>, vector<64x128xf32> -> vector<64x128xf32>
    %36 = arith.addf %30, %35 : vector<64x128xf32>
    %37 = vector.extract_strided_slice %1 {offsets = [2, 0, 0], sizes = [8, 8, 128], strides = [1, 1, 1]} : vector<10x10x128xbf16> to vector<8x8x128xbf16>
    %38 = vector.shape_cast %37 : vector<8x8x128xbf16> to vector<64x128xbf16>
    %c6 = arith.constant 6 : index
    %c0_21 = arith.constant 0 : index
    %c0_22 = arith.constant 0 : index
    %39 = vector.load %arg2[%c6, %c0_21, %c0_22] : memref<9x128x128xbf16, #tpu.memory_space<vmem>>, vector<1x128x128xbf16>
    %40 = vector.shape_cast %39 : vector<1x128x128xbf16> to vector<128x128xbf16>
    %cst_23 = arith.constant dense<0.000000e+00> : vector<64x128xf32>
    %41 = tpu.matmul %38, %40, %cst_23 {dimension_numbers = #tpu.dot_dimension_numbers<[1], [0], [0], [1], [0, 0, 1, 1], [], []>} : vector<64x128xbf16>, vector<128x128xbf16>, vector<64x128xf32> -> vector<64x128xf32>
    %42 = arith.addf %36, %41 : vector<64x128xf32>
    %43 = vector.extract_strided_slice %1 {offsets = [2, 1, 0], sizes = [8, 8, 128], strides = [1, 1, 1]} : vector<10x10x128xbf16> to vector<8x8x128xbf16>
    %44 = vector.shape_cast %43 : vector<8x8x128xbf16> to vector<64x128xbf16>
    %c7 = arith.constant 7 : index
    %c0_24 = arith.constant 0 : index
    %c0_25 = arith.constant 0 : index
    %45 = vector.load %arg2[%c7, %c0_24, %c0_25] : memref<9x128x128xbf16, #tpu.memory_space<vmem>>, vector<1x128x128xbf16>
    %46 = vector.shape_cast %45 : vector<1x128x128xbf16> to vector<128x128xbf16>
    %cst_26 = arith.constant dense<0.000000e+00> : vector<64x128xf32>
    %47 = tpu.matmul %44, %46, %cst_26 {dimension_numbers = #tpu.dot_dimension_numbers<[1], [0], [0], [1], [0, 0, 1, 1], [], []>} : vector<64x128xbf16>, vector<128x128xbf16>, vector<64x128xf32> -> vector<64x128xf32>
    %48 = arith.addf %42, %47 : vector<64x128xf32>
    %49 = vector.extract_strided_slice %1 {offsets = [2, 2, 0], sizes = [8, 8, 128], strides = [1, 1, 1]} : vector<10x10x128xbf16> to vector<8x8x128xbf16>
    %50 = vector.shape_cast %49 : vector<8x8x128xbf16> to vector<64x128xbf16>
    %c8 = arith.constant 8 : index
    %c0_27 = arith.constant 0 : index
    %c0_28 = arith.constant 0 : index
    %51 = vector.load %arg2[%c8, %c0_27, %c0_28] : memref<9x128x128xbf16, #tpu.memory_space<vmem>>, vector<1x128x128xbf16>
    %52 = vector.shape_cast %51 : vector<1x128x128xbf16> to vector<128x128xbf16>
    %cst_29 = arith.constant dense<0.000000e+00> : vector<64x128xf32>
    %53 = tpu.matmul %50, %52, %cst_29 {dimension_numbers = #tpu.dot_dimension_numbers<[1], [0], [0], [1], [0, 0, 1, 1], [], []>} : vector<64x128xbf16>, vector<128x128xbf16>, vector<64x128xf32> -> vector<64x128xf32>
    %54 = arith.addf %48, %53 : vector<64x128xf32>
    %c0_30 = arith.constant 0 : index
    %c0_31 = arith.constant 0 : index
    %55 = vector.load %arg3[%c0_30, %c0_31] : memref<1x128xf32, #tpu.memory_space<vmem>>, vector<1x128xf32>
    %56 = vector.broadcast %55 : vector<1x128xf32> to vector<64x128xf32>
    %57 = arith.mulf %54, %56 : vector<64x128xf32>
    %c0_32 = arith.constant 0 : index
    %c0_33 = arith.constant 0 : index
    %58 = vector.load %arg4[%c0_32, %c0_33] : memref<1x128xf32, #tpu.memory_space<vmem>>, vector<1x128xf32>
    %59 = vector.broadcast %58 : vector<1x128xf32> to vector<64x128xf32>
    %60 = arith.addf %57, %59 : vector<64x128xf32>
    %cst_34 = arith.constant 0.000000e+00 : f32
    %61 = vector.broadcast %cst_34 : f32 to vector<64x128xf32>
    %62 = arith.maximumf %60, %61 : vector<64x128xf32>
    %63 = arith.truncf %62 : vector<64x128xf32> to vector<64x128xbf16>
    %c0_35 = arith.constant 0 : index
    %c0_36 = arith.constant 0 : index
    %64 = vector.load %arg5[%c0_35, %c0_36] : memref<128x128xbf16, #tpu.memory_space<vmem>>, vector<128x128xbf16>
    %cst_37 = arith.constant dense<0.000000e+00> : vector<64x128xf32>
    %65 = tpu.matmul %63, %64, %cst_37 {dimension_numbers = #tpu.dot_dimension_numbers<[1], [0], [0], [1], [0, 0, 1, 1], [], []>} : vector<64x128xbf16>, vector<128x128xbf16>, vector<64x128xf32> -> vector<64x128xf32>
    %c0_38 = arith.constant 0 : index
    %c0_39 = arith.constant 0 : index
    %66 = vector.load %arg6[%c0_38, %c0_39] : memref<1x128xf32, #tpu.memory_space<vmem>>, vector<1x128xf32>
    %67 = vector.broadcast %66 : vector<1x128xf32> to vector<64x128xf32>
    %68 = arith.mulf %65, %67 : vector<64x128xf32>
    %c0_40 = arith.constant 0 : index
    %c0_41 = arith.constant 0 : index
    %69 = vector.load %arg7[%c0_40, %c0_41] : memref<1x128xf32, #tpu.memory_space<vmem>>, vector<1x128xf32>
    %70 = vector.broadcast %69 : vector<1x128xf32> to vector<64x128xf32>
    %71 = arith.addf %68, %70 : vector<64x128xf32>
    %c0_42 = arith.constant 0 : index
    %c0_43 = arith.constant 0 : index
    %c0_44 = arith.constant 0 : index
    %72 = vector.load %arg8[%c0_42, %c0_43, %c0_44] : memref<1x64x128xbf16, #tpu.memory_space<vmem>>, vector<1x64x128xbf16>
    %73 = vector.shape_cast %72 : vector<1x64x128xbf16> to vector<64x128xbf16>
    %c0_45 = arith.constant 0 : index
    %c0_46 = arith.constant 0 : index
    %74 = vector.load %arg9[%c0_45, %c0_46] : memref<128x128xbf16, #tpu.memory_space<vmem>>, vector<128x128xbf16>
    %cst_47 = arith.constant dense<0.000000e+00> : vector<64x128xf32>
    %75 = tpu.matmul %73, %74, %cst_47 {dimension_numbers = #tpu.dot_dimension_numbers<[1], [0], [0], [1], [0, 0, 1, 1], [], []>} : vector<64x128xbf16>, vector<128x128xbf16>, vector<64x128xf32> -> vector<64x128xf32>
    %c0_48 = arith.constant 0 : index
    %c0_49 = arith.constant 0 : index
    %76 = vector.load %arg10[%c0_48, %c0_49] : memref<1x128xf32, #tpu.memory_space<vmem>>, vector<1x128xf32>
    %77 = vector.broadcast %76 : vector<1x128xf32> to vector<64x128xf32>
    %78 = arith.mulf %75, %77 : vector<64x128xf32>
    %c0_50 = arith.constant 0 : index
    %c0_51 = arith.constant 0 : index
    %79 = vector.load %arg11[%c0_50, %c0_51] : memref<1x128xf32, #tpu.memory_space<vmem>>, vector<1x128xf32>
    %80 = vector.broadcast %79 : vector<1x128xf32> to vector<64x128xf32>
    %81 = arith.addf %78, %80 : vector<64x128xf32>
    %82 = arith.addf %71, %81 : vector<64x128xf32>
    %cst_52 = arith.constant 0.000000e+00 : f32
    %83 = vector.broadcast %cst_52 : f32 to vector<64x128xf32>
    %84 = arith.maximumf %82, %83 : vector<64x128xf32>
    %85 = arith.truncf %84 : vector<64x128xf32> to vector<64x128xbf16>
    %c0_53 = arith.constant 0 : index
    %c0_54 = arith.constant 0 : index
    %c0_55 = arith.constant 0 : index
    %86 = vector.load %arg12[%c0_53, %c0_54, %c0_55] : memref<1x64x128xbf16, #tpu.memory_space<vmem>>, vector<1x64x128xbf16>
    %87 = vector.shape_cast %86 : vector<1x64x128xbf16> to vector<64x128xbf16>
    %88 = vector.shape_cast %85 : vector<64x128xbf16> to vector<1x64x128xbf16>
    tpu.vector_store %arg12[%c0_53, %c0_54, %c0_55], %88 {strides = array<i32>} : memref<1x64x128xbf16, #tpu.memory_space<vmem>>, vector<1x64x128xbf16>,
    return
  }
  func.func @transform_0(%arg0: i32) -> (i32, i32, i32, i32) {
    %c0_i32 = arith.constant 0 : i32
    %c0_i32_0 = arith.constant 0 : i32
    %c0_i32_1 = arith.constant 0 : i32
    %c0_i32_2 = arith.constant 0 : i32
    return %arg0, %c0_i32, %c0_i32_0, %c0_i32_1 : i32, i32, i32, i32
  }
  func.func @transform_1(%arg0: i32) -> (i32, i32, i32) {
    %c0_i32 = arith.constant 0 : i32
    %c0_i32_0 = arith.constant 0 : i32
    %c0_i32_1 = arith.constant 0 : i32
    %c0_i32_2 = arith.constant 0 : i32
    return %c0_i32, %c0_i32_0, %c0_i32_1 : i32, i32, i32
  }
  func.func @transform_2(%arg0: i32) -> (i32, i32) {
    %c0_i32 = arith.constant 0 : i32
    %c0_i32_0 = arith.constant 0 : i32
    %c0_i32_1 = arith.constant 0 : i32
    return %c0_i32, %c0_i32_0 : i32, i32
  }
  func.func @transform_3(%arg0: i32) -> (i32, i32) {
    %c0_i32 = arith.constant 0 : i32
    %c0_i32_0 = arith.constant 0 : i32
    %c0_i32_1 = arith.constant 0 : i32
    return %c0_i32, %c0_i32_0 : i32, i32
  }
  func.func @transform_4(%arg0: i32) -> (i32, i32) {
    %c0_i32 = arith.constant 0 : i32
    %c0_i32_0 = arith.constant 0 : i32
    %c0_i32_1 = arith.constant 0 : i32
    return %c0_i32, %c0_i32_0 : i32, i32
  }
  func.func @transform_5(%arg0: i32) -> (i32, i32) {
    %c0_i32 = arith.constant 0 : i32
    %c0_i32_0 = arith.constant 0 : i32
    %c0_i32_1 = arith.constant 0 : i32
    return %c0_i32, %c0_i32_0 : i32, i32
  }
  func.func @transform_6(%arg0: i32) -> (i32, i32) {
    %c0_i32 = arith.constant 0 : i32
    %c0_i32_0 = arith.constant 0 : i32
    %c0_i32_1 = arith.constant 0 : i32
    return %c0_i32, %c0_i32_0 : i32, i32
  }
  func.func @transform_7(%arg0: i32) -> (i32, i32, i32) {
    %c0_i32 = arith.constant 0 : i32
    %c0_i32_0 = arith.constant 0 : i32
    %c0_i32_1 = arith.constant 0 : i32
    return %arg0, %c0_i32, %c0_i32_0 : i32, i32, i32
  }
  func.func @transform_8(%arg0: i32) -> (i32, i32) {
    %c0_i32 = arith.constant 0 : i32
    %c0_i32_0 = arith.constant 0 : i32
    %c0_i32_1 = arith.constant 0 : i32
    return %c0_i32, %c0_i32_0 : i32, i32
  }
  func.func @transform_9(%arg0: i32) -> (i32, i32) {
    %c0_i32 = arith.constant 0 : i32
    %c0_i32_0 = arith.constant 0 : i32
    %c0_i32_1 = arith.constant 0 : i32
    return %c0_i32, %c0_i32_0 : i32, i32
  }
  func.func @transform_10(%arg0: i32) -> (i32, i32) {
    %c0_i32 = arith.constant 0 : i32
    %c0_i32_0 = arith.constant 0 : i32
    %c0_i32_1 = arith.constant 0 : i32
    return %c0_i32, %c0_i32_0 : i32, i32
  }
  func.func @transform_11(%arg0: i32) -> (i32, i32, i32) {
    %c0_i32 = arith.constant 0 : i32
    %c0_i32_0 = arith.constant 0 : i32
    %c0_i32_1 = arith.constant 0 : i32
    return %arg0, %c0_i32, %c0_i32_0 : i32, i32, i32
  }
}

</mosaic_0001>

<bundles_post_ra>
// kernel: bottleneck_forward.2
= control target key start
LH: loop header
LB: loop body
LE: loop exit
PB: predicated region body
PF: predicated region fallthrough
CT: control target
= control target key end

     0   :  { %9 = vsyncpa [#allocation3], 0  ;;  %s819_s0 = inlined_call_operand.vmem [shape: bf16[128,128], index: 0, kind: input, shape index: {}]   ;;  %s820_s1 = inlined_call_operand.hbm [shape: bf16[128,128], index: 1, kind: input, shape index: {}]   ;;  %s821_s2 = inlined_call_operand.hbm [shape: f32[1,128], index: 2, kind: input, shape index: {}]   ;;  %s822_s3 = inlined_call_operand.hbm [shape: f32[1,128], index: 3, kind: input, shape index: {}]   ;;  %s823_s4 = inlined_call_operand.vmem [shape: bf16[128,128], index: 4, kind: output, shape index: {}]  }
   0x1   :  { %10 = vsyncpa [#allocation5], 0  ;;  %s680_s15 = smov [#allocation4]   ;;  %s681_s17 = smov [#allocation2]  }
   0x2   :  { %s31_s16 = sshll.u32 %s680_s15, 4  ;;  %s18_s18 = sshll.u32 %s681_s17, 4  ;;  %s32_s16 = int_to_ptr.vmem [resolvable:$true] %s31_s16  ;;  %s710_s18 = int_to_ptr.vmem [resolvable:$true] %s18_s18 }
   0x3   :  { %s610_s21 = scalar_lea.hbm %s821_s2, 16 }
   0x4   :  { %p611_p0 = scmp.ne.s32.totalorder %s821_s2, %s610_s21  ;;  %p614_p1 = scmp.lt.u32.totalorder %s610_s21, %s821_s2 }
   0x6   :  { %p616_p2 = pnand %p614_p1, %p611_p0 }
   0x8   :  { %619 = shalt.err (!%p616_p2)
}
   0x9   :  { %s620_s26 = scalar_lea.vmem %s32_s16, 16  ;;  %s624_s27 = scalar_lea.vmem %s32_s16, 32 }
   0xa   :  { %p621_p3 = scmp.ne.s32.totalorder %s32_s16, %s620_s26  ;;  %p625_p4 = scmp.lt.s32.totalorder %s32_s16, %s32_s16 }
   0xb   :  { %p626_p5 = scmp.lt.s32.totalorder %s624_s27, %s620_s26 }
   0xd   :  { %p627_p6 = por %p626_p5, %p625_p4 }
   0xf   :  { %p628_p7 = pnand %p627_p6, %p621_p3 }
  0x11   :  { %631 = shalt.err (!%p628_p7)
}
  0x12   :  { %34 = dma.hbm_to_vmem [thread:$0]  %s821_s2, 16, %s32_s16, [#allocation5]  }
  0x13   :  { %s632_s6 = scalar_lea.hbm %s820_s1, 1024 }
  0x14   :  { %p633_p8 = scmp.ne.s32.totalorder %s820_s1, %s632_s6  ;;  %p636_p9 = scmp.lt.u32.totalorder %s632_s6, %s820_s1 }
  0x16   :  { %p638_p10 = pnand %p636_p9, %p633_p8 }
  0x18   :  { %641 = shalt.err (!%p638_p10)
}
  0x19   :  { %s642_s11 = scalar_lea.vmem %s710_s18, 1024  ;;  %p647_p12 = scmp.lt.s32.totalorder %s710_s18, %s710_s18 }
  0x1a   :  { %p643_p11 = scmp.ne.s32.totalorder %s710_s18, %s642_s11  ;;  %p648_p13 = scmp.lt.s32.totalorder %s642_s11, %s642_s11 }
  0x1c   :  { %p649_p0 = por %p648_p13, %p647_p12 }
  0x1e   :  { %p650_p1 = pnand %p649_p0, %p643_p11 }
  0x20   :  { %653 = shalt.err (!%p650_p1)
}
  0x21   :  { %s682_s2 = smov 64   ;;  %s683_s12 = smov 4  }
  0x22   :  { %24 = dma.hbm_to_vmem [thread:$0]  %s820_s1, 1024, %s710_s18, [#allocation3], %s682_s2, %s682_s2, %s683_s12  }
  0x23   :  { %s684_s15 = smov [#allocation6]   ;;  %s654_s20 = scalar_lea.hbm %s822_s3, 16 }
  0x24   :  { %s41_s16 = sshll.u32 %s684_s15, 4  ;;  %p655_p2 = scmp.ne.s32.totalorder %s822_s3, %s654_s20  ;;  %s42_s16 = int_to_ptr.vmem [resolvable:$true] %s41_s16 }
  0x25   :  { %p658_p3 = scmp.lt.u32.totalorder %s654_s20, %s822_s3 }
  0x27   :  { %p660_p4 = pnand %p658_p3, %p655_p2 }
  0x29   :  { %663 = shalt.err (!%p660_p4)
}
  0x2a   :  { %s664_s25 = scalar_lea.vmem %s42_s16, 16  ;;  %s668_s1 = scalar_lea.vmem %s42_s16, 32 }
  0x2b   :  { %p665_p5 = scmp.ne.s32.totalorder %s42_s16, %s664_s25  ;;  %p669_p6 = scmp.lt.s32.totalorder %s42_s16, %s42_s16 }
  0x2c   :  { %p670_p7 = scmp.lt.s32.totalorder %s668_s1, %s664_s25 }
  0x2e   :  { %p671_p8 = por %p670_p7, %p669_p6 }
  0x30   :  { %p672_p9 = pnand %p671_p8, %p665_p5 }
  0x32   :  { %675 = shalt.err (!%p672_p9)
}
  0x33   :  { %44 = dma.hbm_to_vmem [thread:$0]  %s822_s3, 16, %s42_s16, [#allocation5]  }
  0x34   :  { %676 = dma.done.wait [#allocation3], 1024  }
  0x35   :  { %677 = vsyncadd [#allocation3], 4294966272 }
  0x36   :  { %678 = dma.done.wait [#allocation5], 32  }
  0x37   :  { %679 = vsyncadd [#allocation5], 4294967264  ;;  %v594_v0 = vld [vmem:[#allocation2] sm:$0xff]   ;;  %v595_v1 = vld [vmem:[#allocation2 + $0x8] sm:$0xff]  }
  0x38   :  { %541 = vmatprep.subr.bf16.mxu0 %v594_v0  ;;  %573 = vmatprep.subr.bf16.mxu1 %v594_v0  ;;  %v596_v2 = vld [vmem:[#allocation2 + $0x10] sm:$0xff]   ;;  %v597_v3 = vld [vmem:[#allocation2 + $0x18] sm:$0xff]   ;;  %v602_v4 = vld [vmem:[%s819_s0] sm:$0xff]  }
  0x39   :  { %542 = vmatpush3.bf16.msra.mxu0 %v594_v0  ;;  %581 = vmatpush3.bf16.msra.mxu1 %v594_v0  ;;  %v603_v5 = vld [vmem:[%s819_s0 + $0x20] sm:$0xff]   ;;  %v599_v7 = vld [vmem:[#allocation2 + $0x28] sm:$0xff]   ;;  %v600_v8 = vld [vmem:[#allocation2 + $0x30] sm:$0xff]  }
  0x3a   :  { %543 = vmatprep.subr.bf16.mxu0 %v595_v1  ;;  %574 = vmatprep.subr.bf16.mxu1 %v595_v1  ;;  %v598_v6 = vld [vmem:[#allocation2 + $0x20] sm:$0xff]   ;;  %v601_v9 = vld [vmem:[#allocation2 + $0x38] sm:$0xff]   ;;  %v604_v10 = vld [vmem:[%s819_s0 + $0x8] sm:$0xff]  }
  0x3b   :  { %557 = vmatprep.mubr.bf16.mxu0 %v602_v4  ;;  %565 = vmatprep.mubr.bf16.mxu1 %v603_v5  ;;  %v605_v11 = vld [vmem:[%s819_s0 + $0x28] sm:$0xff]   ;;  %v606_v12 = vld [vmem:[%s819_s0 + $0x10] sm:$0xff]   ;;  %v608_v14 = vld [vmem:[%s819_s0 + $0x18] sm:$0xff]  }
  0x3c   :  { %v607_v13 = vld [vmem:[%s819_s0 + $0x30] sm:$0xff]   ;;  %v609_v15 = vld [vmem:[%s819_s0 + $0x38] sm:$0xff]   ;;  %v444_v16 = vld [vmem:[#allocation4] ss:$0 sm:$0xff] }
  0x3d   :  { %544 = vmatpush3.bf16.msra.mxu0 %v595_v1  ;;  %582 = vmatpush3.bf16.msra.mxu1 %v595_v1  ;;  %v777_v18 = vld [vmem:[#allocation6] ss:$0 sm:$0xff] }
  0x3e   :  { %545 = vmatprep.subr.bf16.mxu0 %v596_v2  ;;  %575 = vmatprep.subr.bf16.mxu1 %v596_v2 }
  0x41   :  { %546 = vmatpush3.bf16.msra.mxu0 %v596_v2  ;;  %583 = vmatpush3.bf16.msra.mxu1 %v596_v2 }
  0x42   :  { %547 = vmatprep.subr.bf16.mxu0 %v597_v3  ;;  %576 = vmatprep.subr.bf16.mxu1 %v597_v3 }
  0x45   :  { %548 = vmatpush3.bf16.msra.mxu0 %v597_v3  ;;  %584 = vmatpush3.bf16.msra.mxu1 %v597_v3 }
  0x46   :  { %549 = vmatprep.subr.bf16.mxu0 %v598_v6  ;;  %577 = vmatprep.subr.bf16.mxu1 %v598_v6 }
  0x49   :  { %550 = vmatpush3.bf16.msra.mxu0 %v598_v6  ;;  %585 = vmatpush3.bf16.msra.mxu1 %v598_v6 }
  0x4a   :  { %551 = vmatprep.subr.bf16.mxu0 %v599_v7  ;;  %578 = vmatprep.subr.bf16.mxu1 %v599_v7 }
  0x4d   :  { %552 = vmatpush3.bf16.msra.mxu0 %v599_v7  ;;  %586 = vmatpush3.bf16.msra.mxu1 %v599_v7 }
  0x4e   :  { %553 = vmatprep.subr.bf16.mxu0 %v600_v8  ;;  %579 = vmatprep.subr.bf16.mxu1 %v600_v8 }
  0x51   :  { %554 = vmatpush3.bf16.msra.mxu0 %v600_v8  ;;  %587 = vmatpush3.bf16.msra.mxu1 %v600_v8 }
  0x52   :  { %555 = vmatprep.subr.bf16.mxu0 %v601_v9  ;;  %580 = vmatprep.subr.bf16.mxu1 %v601_v9 }
  0x55   :  { %556 = vmatpush3.bf16.msra.mxu0 %v601_v9  ;;  %588 = vmatpush3.bf16.msra.mxu1 %v601_v9 }
  0x58   :  { %558 = vmatmul.mubr.bf16.vlgmr.msra.gmra.mrb[0].mxu0 %v604_v10  ;;  %566 = vmatmul.mubr.bf16.vlgmr.msra.gmra.mrb[0].mxu1 %v605_v11 }
  0x59   :  { %561 = vmatprep.mubr.bf16.mxu0 %v606_v12  ;;  %569 = vmatprep.mubr.bf16.mxu1 %v607_v13 }
  0x60   :  { %562 = vmatmul.mubr.bf16.gmra.mrb[4].mxu0 %v608_v14  ;;  %570 = vmatmul.mubr.bf16.gmra.mrb[4].mxu1 %v609_v15 }
 0x12b   :  { %v559_v17 = vpop.f32.mrb[0].mxu0  ;;  %v567_v19 = vpop.f32.mrb[0].mxu1 }
 0x12c   :  { %v289_v20 = vmul.f32 %v559_v17, %v444_v16  ;;  %v297_v21 = vmul.f32 %v567_v19, %v444_v16  ;;  %v217_v22 = vpop.f32.mrb[1].mxu0  ;;  %v249_v23 = vpop.f32.mrb[1].mxu1 }
 0x12d   :  { %v287_v24 = vmul.f32 %v444_v16, %v217_v22  ;;  %v295_v25 = vmul.f32 %v444_v16, %v249_v23  ;;  %v560_v26 = vpop.f32.mrb[2].mxu0  ;;  %v568_v27 = vpop.f32.mrb[2].mxu1 }
 0x12e   :  { %v312_v28 = vadd.f32 %v777_v18, %v289_v20  ;;  %v320_v29 = vadd.f32 %v777_v18, %v297_v21  ;;  %v290_v30 = vmul.f32 %v560_v26, %v444_v16  ;;  %v298_v31 = vmul.f32 %v568_v27, %v444_v16  ;;  %v220_v32 = vpop.f32.mrb[3].mxu0  ;;  %v252_v33 = vpop.f32.mrb[3].mxu1 }
 0x12f   :  { %v310_v34 = vadd.f32 %v777_v18, %v287_v24  ;;  %v318_v35 = vadd.f32 %v777_v18, %v295_v25  ;;  %v288_v36 = vmul.f32 %v444_v16, %v220_v32  ;;  %v296_v37 = vmul.f32 %v444_v16, %v252_v33 }
 0x130   :  { %v313_v38 = vadd.f32 %v777_v18, %v290_v30  ;;  %v321_v39 = vadd.f32 %v777_v18, %v298_v31  ;;  %v328_v42 = vmax.f32 %v312_v28, 0.0  ;;  %v336_v43 = vmax.f32 %v320_v29, 0.0 }
 0x131   :  { %v311_v40 = vadd.f32 %v777_v18, %v288_v36  ;;  %v319_v41 = vadd.f32 %v777_v18, %v296_v37  ;;  %v326_v46 = vmax.f32 %v310_v34, 0.0  ;;  %v334_v47 = vmax.f32 %v318_v35, 0.0 }
 0x132   :  { %v329_v44 = vmax.f32 %v313_v38, 0.0  ;;  %v337_v45 = vmax.f32 %v321_v39, 0.0 }
 0x133   :  { %v327_v48 = vmax.f32 %v311_v40, 0.0  ;;  %v335_v49 = vmax.f32 %v319_v41, 0.0  ;;  %v563_v50 = vpop.f32.mrb[4].mxu0  ;;  %v571_v51 = vpop.f32.mrb[4].mxu1 }
 0x134   :  { %v486_v52 = vpack.c.bf16 %v329_v44, %v328_v42  ;;  %v506_v53 = vpack.c.bf16 %v337_v45, %v336_v43  ;;  %v293_v54 = vmul.f32 %v563_v50, %v444_v16  ;;  %v301_v55 = vmul.f32 %v571_v51, %v444_v16  ;;  %v233_v56 = vpop.f32.mrb[5].mxu0  ;;  %v265_v57 = vpop.f32.mrb[5].mxu1 }
 0x135   :  { %v481_v58 = vpack.c.bf16 %v327_v48, %v326_v46  ;;  %v501_v59 = vpack.c.bf16 %v335_v49, %v334_v47  ;;  %v291_v60 = vmul.f32 %v444_v16, %v233_v56  ;;  %v299_v61 = vmul.f32 %v444_v16, %v265_v57  ;;  %v564_v62 = vpop.f32.mrb[6].mxu0  ;;  %v572_v63 = vpop.f32.mrb[6].mxu1 }
 0x136   :  { %518 = vst [vmem:[%s823_s4 + $0x8] sm:$0xff] %v486_v52   ;;  %522 = vst [vmem:[%s823_s4 + $0x28] sm:$0xff] %v506_v53   ;;  %v316_v0 = vadd.f32 %v777_v18, %v293_v54  ;;  %v324_v1 = vadd.f32 %v777_v18, %v301_v55  ;;  %v294_v2 = vmul.f32 %v564_v62, %v444_v16  ;;  %v236_v4 = vpop.f32.mrb[7].mxu0  ;;  %v268_v5 = vpop.f32.mrb[7].mxu1 }
 0x137   :  { %v302_v3 = vmul.f32 %v572_v63, %v444_v16  ;;  %482 = vst [vmem:[%s823_s4] sm:$0xff] %v481_v58   ;;  %521 = vst [vmem:[%s823_s4 + $0x20] sm:$0xff] %v501_v59   ;;  %v314_v6 = vadd.f32 %v777_v18, %v291_v60  ;;  %v322_v7 = vadd.f32 %v777_v18, %v299_v61 }
 0x138   :  { %v292_v8 = vmul.f32 %v444_v16, %v236_v4  ;;  %v300_v9 = vmul.f32 %v444_v16, %v268_v5  ;;  %v317_v10 = vadd.f32 %v777_v18, %v294_v2  ;;  %v332_v14 = vmax.f32 %v316_v0, 0.0 }
 0x139   :  { %v325_v11 = vadd.f32 %v777_v18, %v302_v3  ;;  %v340_v15 = vmax.f32 %v324_v1, 0.0  ;;  %v330_v20 = vmax.f32 %v314_v6, 0.0  ;;  %v338_v21 = vmax.f32 %v322_v7, 0.0 }
 0x13a   :  { %v315_v12 = vadd.f32 %v777_v18, %v292_v8  ;;  %v323_v13 = vadd.f32 %v777_v18, %v300_v9  ;;  %v333_v17 = vmax.f32 %v317_v10, 0.0 }
 0x13b   :  { %v341_v19 = vmax.f32 %v325_v11, 0.0 }
 0x13c   :  { %v331_v22 = vmax.f32 %v315_v12, 0.0  ;;  %v339_v23 = vmax.f32 %v323_v13, 0.0  ;;  %v496_v24 = vpack.c.bf16 %v333_v17, %v332_v14 }
 0x13d   :  { %v516_v25 = vpack.c.bf16 %v341_v19, %v340_v15 }
 0x13e   :  { %v491_v26 = vpack.c.bf16 %v331_v22, %v330_v20  ;;  %v511_v16 = vpack.c.bf16 %v339_v23, %v338_v21  ;;  %520 = vst [vmem:[%s823_s4 + $0x18] sm:$0xff] %v496_v24  }
 0x13f   :  { %524 = vst [vmem:[%s823_s4 + $0x38] sm:$0xff] %v516_v25  }
 0x140   :  { %519 = vst [vmem:[%s823_s4 + $0x10] sm:$0xff] %v491_v26   ;;  %523 = vst [vmem:[%s823_s4 + $0x30] sm:$0xff] %v511_v16  }
 0x141   :  { %426 = vsyncpa [#allocation3], 1 }
 0x142   :  { %427 = vsyncpa [#allocation5], 1 }

// kernel: bottleneck_forward.3
= control target key start
LH: loop header
LB: loop body
LE: loop exit
PB: predicated region body
PF: predicated region fallthrough
CT: control target
= control target key end

     0   :  { %s3412_s17 = smov 0   ;;  %s3969_s0 = inlined_call_operand.vmem [shape: bf16[2,10,10,128], index: 0, kind: input, shape index: {}]   ;;  %s3970_s1 = inlined_call_operand.vmem [shape: bf16[9,128,128], index: 1, kind: input, shape index: {}]   ;;  %s3971_s2 = inlined_call_operand.vmem [shape: f32[1,128], index: 2, kind: input, shape index: {}]   ;;  %s3972_s3 = inlined_call_operand.vmem [shape: f32[1,128], index: 3, kind: input, shape index: {}]   ;;  %s3973_s4 = inlined_call_operand.vmem [shape: bf16[128,128], index: 4, kind: input, shape index: {}]   ;;  %s3974_s5 = inlined_call_operand.vmem [shape: f32[1,128], index: 5, kind: input, shape index: {}]   ;;  %s3975_s6 = inlined_call_operand.vmem [shape: f32[1,128], index: 6, kind: input, shape index: {}]   ;;  %s3976_s7 = inlined_call_operand.vmem [shape: bf16[2,64,128], index: 7, kind: input, shape index: {}]   ;;  %s3977_s8 = inlined_call_operand.vmem [shape: bf16[128,128], index: 8, kind: input, shape index: {}]   ;;  %s3978_s9 = inlined_call_operand.vmem [shape: f32[1,128], index: 9, kind: input, shape index: {}]   ;;  %s3979_s10 = inlined_call_operand.vmem [shape: f32[1,128], index: 10, kind: input, shape index: {}]   ;;  %s3980_s11 = inlined_call_operand.vmem [shape: bf16[2,64,128], index: 11, kind: output, shape index: {}]  }
   0x1 LB: > { %s2458_s18 = sadd.s32 4294967295, %s3350_s17   ;;  %p2462_p0 = scmp.ge.s32.totalorder %s3350_s17, 1  ;;  %s3350_s17 = sphi %s3412_s17, %s21_s17  }
   0x2   : > { %p347_p1 = scmp.lt.s32.totalorder %s3350_s17, 3 }
   0x4   : > { %p348_p2 = pnand %p2462_p0, %p347_p1 }
   0x5   : > { %v3243_v0 = vld [vmem:[%s3970_s1 + $0xc0] sm:$0xff] (!%p348_p2)   ;;  %p392_p3 = scmp.lt.s32.totalorder (!%p348_p2), %s2458_s18, 1  ;;  %v3244_v1 = vld [vmem:[%s3970_s1 + $0xc8] sm:$0xff] (!%p348_p2)   ;;  %v3245_v2 = vld [vmem:[%s3970_s1 + $0xd0] sm:$0xff] (!%p348_p2)   ;;  %vm444_vm0 = vsmask.f32 (!%p348_p2), 3328 }
   0x6   : > { %351 = sbr.rel (%p348_p2) target bundleno = 690 (0x2b2), region = 64  ;;  %2978 = vmatprep.subr.bf16.mxu0 (!%p348_p2), %v3243_v0  ;;  %v3246_v3 = vld [vmem:[%s3970_s1 + $0xd8] sm:$0xff] (!%p348_p2)   ;;  %v3251_v4 = vld [vmem:[%s3970_s1 + $0x40] sm:$0xff] (!%p348_p2)   ;;  %v3255_v10 = vld [vmem:[%s3970_s1 + $0x48] sm:$0xff] (!%p348_p2)   ;;  %vm445_vm1 = vsmask.f32 (!%p348_p2), 7440 }
   0x7   : > { %2979 = vmatpush3.bf16.msra.mxu0 (!%p348_p2), %v3243_v0  ;;  %2906 = vmatprep.subr.bf16.mxu1 (!%p348_p2), %v3251_v4  ;;  %v3247_v8 = vld [vmem:[%s3970_s1 + $0xe0] sm:$0xff] (!%p348_p2)   ;;  %v3248_v12 = vld [vmem:[%s3970_s1 + $0xe8] sm:$0xff] (!%p348_p2)   ;;  %v3257_v13 = vld [vmem:[%s3970_s1 + $0x50] sm:$0xff] (!%p348_p2)   ;;  %vm850_vm3 = vcmask (!%p348_p2), 1042432   ;;  %vm851_vm4 = vcmask (!%p348_p2), 1046532  }
   0x8   : > { %2980 = vmatprep.subr.bf16.mxu0 (!%p348_p2), %v3244_v1  ;;  %2907 = vmatpush3.bf16.msra.mxu1 (!%p348_p2), %v3251_v4  ;;  %v3259_v16 = vld [vmem:[%s3970_s1 + $0x58] sm:$0xff] (!%p348_p2)   ;;  %v3249_v19 = vld [vmem:[%s3970_s1 + $0xf0] sm:$0xff] (!%p348_p2)   ;;  %v3261_v22 = vld [vmem:[%s3970_s1 + $0x60] sm:$0xff] (!%p348_p2)  }
   0x9   : > { %2908 = vmatprep.subr.bf16.mxu1 (!%p348_p2), %v3255_v10  ;;  %v3250_v24 = vld [vmem:[%s3970_s1 + $0xf8] sm:$0xff] (!%p348_p2)   ;;  %v3263_v30 = vld [vmem:[%s3970_s1 + $0x68] sm:$0xff] (!%p348_p2)   ;;  %v3253_v34 = vld [vmem:[%s3970_s1 + $0x100] sm:$0xff] (!%p348_p2)  }
   0xa   : > { %v3265_v35 = vld [vmem:[%s3970_s1 + $0x70] sm:$0xff] (!%p348_p2)   ;;  %vm3524_vm2 = vmor (!%p348_p2), %vm444_vm0, %vm445_vm1  ;;  %v3256_v59 = vld [vmem:[%s3970_s1 + $0x108] sm:$0xff] (!%p348_p2)  }
   0xb   : > { %2981 = vmatpush3.bf16.msra.mxu0 (!%p348_p2), %v3244_v1  ;;  %vm3664_vm5 = vmor (!%p348_p2), %vm850_vm3, %vm851_vm4 }
   0xc   : > { %2982 = vmatprep.subr.bf16.mxu0 (!%p348_p2), %v3245_v2  ;;  %2909 = vmatpush3.bf16.msra.mxu1 (!%p348_p2), %v3255_v10 }
   0xd   : > { %s3986_s18 = smov (!%p392_p3, %s2458_s18), 1  ;;  %2910 = vmatprep.subr.bf16.mxu1 %v3257_v13 }
   0xe   : > { %s3234_s25 = smul.u32 80, %s3986_s18  ;;  %s2741_s19 = sshll.u32 %s3986_s18, 5 }
   0xf   : > { %2983 = vmatpush3.bf16.msra.mxu0 %v3245_v2  ;;  %v3269_v2 = vld [vmem:[%s3970_s1 + $0x78] sm:$0xff]   ;;  %s3916_s22 = scalar_lea.vmem %s3976_s7, %s2741_s19  ;;  %s406_s16 = scalar_lea.vmem %s3980_s11, %s2741_s19 }
  0x10   : > { %s3435_s28 = scalar_lea.vmem %s3969_s0, %s3234_s25  ;;  %2984 = vmatprep.subr.bf16.mxu0 %v3246_v3  ;;  %2911 = vmatpush3.bf16.msra.mxu1 %v3257_v13 }
  0x11   : > { %v3444_v5 = vld [vmem:[%s3435_s28 + $0x8] sm:$0xf]  ;;  %v3447_v6 = vld [vmem:[%s3435_s28 + $0x10] sm:$0xf]  ;;  %v3469_v17 = vld [vmem:[%s3435_s28 + $0x18] sm:$0xf]  ;;  %2912 = vmatprep.subr.bf16.mxu1 %v3259_v16 }
  0x12   : > { %v2560_v7 = vcombine.low %v3444_v5, %v3447_v6  ;;  %v462_v9 = vshrl.u32 %v3444_v5, 16  ;;  %v465_v11 = vshll.u32 %v3444_v5, 16  ;;  %v476_v18 = vshrl.u32 %v3447_v6, 16  ;;  %v3484_v25 = vld [vmem:[%s3435_s28 + $0x20] sm:$0xf] }
  0x13   : > { %2985 = vmatpush3.bf16.msra.mxu0 %v3246_v3  ;;  %v479_v21 = vshll.u32 %v3447_v6, 16  ;;  %v490_v23 = vshrl.u32 %v3469_v17, 16  ;;  %v493_v27 = vshll.u32 %v3469_v17, 16  ;;  %v3491_v31 = vld [vmem:[%s3435_s28 + $0x28] sm:$0xf]  ;;  %v2561_v38 = vcombine.low %v3469_v17, %v3484_v25  ;;  %v3258_v3 = vld [vmem:[%s3970_s1 + $0x110] sm:$0xff]  }
  0x14   : > { %2994 = vmatprep.mubr.bf16.mxu0 %v2560_v7  ;;  %v464_v14 = vrot.slane %v462_v9, 4  ;;  %v467_v15 = vrot.slane %v465_v11, 5  ;;  %2986 = vmatprep.subr.bf16.mxu0 %v3247_v8  ;;  %v478_v26 = vrot.slane %v476_v18, 4  ;;  %v3494_v33 = vld [vmem:[%s3435_s28 + $0x30] sm:$0xf]  ;;  %v504_v52 = vshrl.u32 %v3484_v25, 16 }
  0x15   : > { %2913 = vmatpush3.bf16.msra.mxu1 %v3259_v16  ;;  %v481_v29 = vrot.slane %v479_v21, 5  ;;  %v492_v32 = vrot.slane %v490_v23, 4  ;;  %v3503_v36 = vld [vmem:[%s3435_s28] sm:$0xf]  ;;  %v495_v37 = vrot.slane %v493_v27, 5  ;;  %v2562_v45 = vcombine.low %v3491_v31, %v3494_v33 }
  0x16   : > { %v468_v20 = vor.u32 %v467_v15, %v464_v14  ;;  %2914 = vmatprep.subr.bf16.mxu1 %v3261_v22  ;;  %v3508_v39 = vld [vmem:[%s3435_s28 + $0x4] sm:$0x1]  ;;  %v3511_v40 = vld [vmem:[%s3435_s28 + $0xc] sm:$0x1]  ;;  %v3514_v41 = vld [vmem:[%s3435_s28 + $0x14] sm:$0x1] }
  0x17   : > { %2987 = vmatpush3.bf16.msra.mxu0 %v3247_v8  ;;  %v482_v42 = vor.u32 %v481_v29, %v478_v26  ;;  %v448_v43 = vshrl.u32 %v3503_v36, 16  ;;  %v451_v44 = vshll.u32 %v3503_v36, 16  ;;  %v457_v46 = vshll.u32 %v3508_v39, 16  ;;  %v3529_v58 = vld [vmem:[%s3435_s28 + $0x1c] sm:$0x1]  ;;  %v3271_v16 = vld [vmem:[%s3970_s1] sm:$0xff]  }
  0x18   : > { %2988 = vmatprep.subr.bf16.mxu0 %v3248_v12  ;;  %v469_v28 = vrot.slane %v468_v20, 4  ;;  %v471_v47 = vshll.u32 %v3511_v40, 16  ;;  %v485_v48 = vshll.u32 %v3514_v41, 16  ;;  %v496_v51 = vor.u32 %v495_v37, %v492_v32  ;;  %v3537_v0 = vld [vmem:[%s3435_s28 + $0x38] sm:$0xf]  ;;  %v3275_v37 = vld [vmem:[%s3970_s1 + $0x10] sm:$0xff]  }
  0x19   : > { %2915 = vmatpush3.bf16.msra.mxu1 %v3261_v22  ;;  %v450_v49 = vrot.slane %v448_v43, 4  ;;  %v453_v50 = vrot.slane %v451_v44, 5  ;;  %v459_v54 = vrot.slane %v457_v46, 5  ;;  %v483_v56 = vrot.slane %v482_v42, 4  ;;  %v3540_v1 = vld [vmem:[%s3435_s28 + $0x40] sm:$0xf] }
  0x1a   : > { %2916 = vmatprep.subr.bf16.mxu1 %v3263_v30  ;;  %v473_v55 = vrot.slane %v471_v47, 5  ;;  %v487_v57 = vrot.slane %v485_v48, 5  ;;  %v497_v61 = vrot.slane %v496_v51, 4  ;;  %v499_v62 = vshll.u32 %v3529_v58, 16  ;;  %v3551_v8 = vld [vmem:[%s3435_s28 + $0x24] sm:$0x1] }
  0x1b   : > { %2989 = vmatpush3.bf16.msra.mxu0 %v3248_v12  ;;  %v454_v60 = vor.u32 %v453_v50, %v450_v49  ;;  %v507_v63 = vshll.u32 %v3484_v25, 16  ;;  %v506_v11 = vrot.slane %v504_v52, 4  ;;  %v518_v18 = vshrl.u32 %v3491_v31, 16  ;;  %v3260_v22 = vld [vmem:[%s3970_s1 + $0x118] sm:$0xff]   ;;  %v3591_v44 = vld [vmem:[%s3435_s28 + $0x34] sm:$0x1] }
  0x1c   : > { %2990 = vmatprep.subr.bf16.mxu0 %v3249_v19  ;;  %v474_v7 = vsel %vm3524_vm2, %v469_v28, %v473_v55  ;;  %v501_v9 = vrot.slane %v499_v62, 5  ;;  %v488_v10 = vsel %vm3524_vm2, %v483_v56, %v487_v57  ;;  %v513_v20 = vshll.u32 %v3551_v8, 16  ;;  %v3273_v28 = vld [vmem:[%s3970_s1 + $0x8] sm:$0xff]   ;;  %v3277_v56 = vld [vmem:[%s3970_s1 + $0x18] sm:$0xff]  }
  0x1d   : > { %2917 = vmatpush3.bf16.msra.mxu1 %v3263_v30  ;;  %v455_v4 = vrot.slane %v454_v60, 4  ;;  %v509_v12 = vrot.slane %v507_v63, 5  ;;  %v520_v26 = vrot.slane %v518_v18, 4  ;;  %v521_v27 = vshll.u32 %v3491_v31, 16  ;;  %v3262_v30 = vld [vmem:[%s3970_s1 + $0x120] sm:$0xff]   ;;  %v3264_v55 = vld [vmem:[%s3970_s1 + $0x128] sm:$0xff]  }
  0x1e   : > { %2918 = vmatprep.subr.bf16.mxu1 %v3265_v35  ;;  %v3559_v14 = vsel %vm3524_vm2, %v497_v61, %v501_v9  ;;  %v532_v29 = vshrl.u32 %v3494_v33, 16  ;;  %v515_v32 = vrot.slane %v513_v20, 5  ;;  %v535_v48 = vshll.u32 %v3494_v33, 16 }
  0x1f   : > { %2991 = vmatpush3.bf16.msra.mxu0 %v3249_v19  ;;  %v460_v13 = vsel %vm3524_vm2, %v455_v4, %v459_v54  ;;  %v2563_v19 = vcombine.low %v3537_v0, %v3540_v1  ;;  %v3569_v21 = vcombine.low %v488_v10, %v3559_v14  ;;  %v510_v23 = vor.u32 %v509_v12, %v506_v11  ;;  %v3267_v11 = vld [vmem:[%s3970_s1 + $0x130] sm:$0xff]   ;;  %v3279_v12 = vld [vmem:[%s3970_s1 + $0x20] sm:$0xff]  }
  0x20   : > { %2992 = vmatprep.subr.bf16.mxu0 %v3250_v24  ;;  %v2484_v15 = vcombine.low %v460_v13, %v474_v7  ;;  %v534_v46 = vrot.slane %v532_v29, 4  ;;  %v541_v49 = vshll.u32 %v3591_v44, 16  ;;  %v546_v50 = vshrl.u32 %v3537_v0, 16 }
  0x21   : > { %2919 = vmatpush3.bf16.msra.mxu1 %v3265_v35  ;;  %v511_v35 = vrot.slane %v510_v23, 4  ;;  %v549_v52 = vshll.u32 %v3537_v0, 16  ;;  %v537_v57 = vrot.slane %v535_v48, 5  ;;  %v1188_v4 = vshrl.u32 %v3540_v1, 16  ;;  %v3281_v23 = vld [vmem:[%s3970_s1 + $0x28] sm:$0xff]  }
  0x22   : > { %2920 = vmatprep.subr.bf16.mxu1 %v3269_v2  ;;  %2922 = vmatprep.mubr.bf16.mxu1 %v2484_v15  ;;  %v863_v48 = vrot.slane %v3514_v41, 5  ;;  %v3288_v41 = vld [vmem:[%s3970_s1 + $0x80] sm:$0xff]  }
  0x23   : > { %2993 = vmatpush3.bf16.msra.mxu0 %v3250_v24  ;;  %v2588_v24 = vcombine.low %v474_v7, %v488_v10  ;;  %v516_v60 = vsel %vm3524_vm2, %v511_v35, %v515_v32  ;;  %v551_v62 = vrot.slane %v549_v52, 5  ;;  %v1191_v10 = vshll.u32 %v3540_v1, 16  ;;  %v3283_v32 = vld [vmem:[%s3970_s1 + $0x30] sm:$0xff]  }
  0x24   : > { %3002 = vmatprep.subr.bf16.mxu0 %v3253_v34  ;;  %v1190_v20 = vrot.slane %v1188_v4, 4  ;;  %v2589_v35 = vcombine.low %v3559_v14, %v516_v60  ;;  %v2510_v14 = vrot.slane %v3447_v6, 9 }
  0x25   : > { %2921 = vmatpush3.bf16.msra.mxu1 %v3269_v2  ;;  %v538_v2 = vor.u32 %v537_v57, %v534_v46 }
  0x26   : > { %2995 = vmatmul.mubr.bf16.vlgmr.msra.gmra.mrb[0].mxu0 %v2561_v38  ;;  %2930 = vmatprep.subr.bf16.mxu1 %v3271_v16  ;;  %v3587_v38 = vld [vmem:[%s3435_s28 + $0x2c] sm:$0x1]  ;;  %v3682_v52 = vsel %vm3664_vm5, %v2510_v14, %v863_v48 }
  0x27   : > { %3003 = vmatpush3.bf16.msra.mxu0 %v3253_v34  ;;  %2998 = vmatprep.mubr.bf16.mxu0 %v2562_v45  ;;  %v523_v34 = vrot.slane %v521_v27, 5  ;;  %v527_v43 = vshll.u32 %v3587_v38, 16  ;;  %v3594_v45 = vld [vmem:[%s3435_s28 + $0x3c] sm:$0x1]  ;;  %v539_v13 = vrot.slane %v538_v2, 4  ;;  %v2496_v27 = vcombine.low %v3503_v36, %v3444_v5 }
  0x28   : > { %3004 = vmatprep.subr.bf16.mxu0 %v3256_v59  ;;  %2923 = vmatmul.mubr.bf16.vlgmr.msra.gmra.mrb[0].mxu1 %v3569_v21  ;;  %v555_v54 = vshll.u32 %v3594_v45, 16  ;;  %v3710_v2 = vld [vmem:[%s3435_s28 + $0x48] sm:$0xf] }
  0x29   : > { %2931 = vmatpush3.bf16.msra.mxu1 %v3271_v16  ;;  %v524_v42 = vor.u32 %v523_v34, %v520_v26  ;;  %v529_v51 = vrot.slane %v527_v43, 5  ;;  %v3270_v16 = vld [vmem:[%s3970_s1 + $0x138] sm:$0xff]   ;;  %v3638_v26 = vld [vmem:[%s3435_s28 + $0x44] sm:$0x1]  ;;  %v859_v34 = vrot.slane %v3511_v40, 5  ;;  %v2509_v40 = vrot.slane %v3444_v5, 9 }
  0x2a   : > { %2932 = vmatprep.subr.bf16.mxu1 %v3273_v28  ;;  %v557_v9 = vrot.slane %v555_v54, 5  ;;  %v1646_v4 = vshll.u32 %v3710_v2, 16 }
  0x2b   : > { %3005 = vmatpush3.bf16.msra.mxu0 %v3256_v59  ;;  %v525_v47 = vrot.slane %v524_v42, 4  ;;  %v548_v59 = vrot.slane %v546_v50, 4  ;;  %v3276_v50 = vld [vmem:[%s3970_s1 + $0x150] sm:$0xff]  }
  0x2c   : > { %3006 = vmatprep.subr.bf16.mxu0 %v3258_v3 }
  0x2d   : > { %2933 = vmatpush3.bf16.msra.mxu1 %v3273_v28  ;;  %v3611_v61 = vsel %vm3524_vm2, %v525_v47, %v529_v51  ;;  %v552_v7 = vor.u32 %v551_v62, %v548_v59  ;;  %v3272_v28 = vld [vmem:[%s3970_s1 + $0x140] sm:$0xff]   ;;  %v3285_v47 = vld [vmem:[%s3970_s1 + $0x38] sm:$0xff]   ;;  %v860_v51 = vsel %vm3664_vm5, %v2509_v40, %v859_v34  ;;  %v855_v59 = vrot.slane %v3508_v39, 5  ;;  %v3293_v39 = vld [vmem:[%s3970_s1 + $0x90] sm:$0xff]  }
  0x2e   : > { %2999 = vmatmul.mubr.bf16.gmra.mrb[4].mxu0 %v2563_v19  ;;  %2934 = vmatprep.subr.bf16.mxu1 %v3275_v37  ;;  %v3614_v63 = vcombine.low %v516_v60, %v3611_v61  ;;  %v2617_v57 = vcombine.low %v860_v51, %v3682_v52  ;;  %v3291_v60 = vld [vmem:[%s3970_s1 + $0x88] sm:$0xff]   ;;  %v2508_v62 = vrot.slane %v3503_v36, 9 }
  0x2f   : > { %3007 = vmatpush3.bf16.msra.mxu0 %v3258_v3  ;;  %3018 = vmatprep.mubr.bf16.mxu0 %v2588_v24  ;;  %v543_v3 = vrot.slane %v541_v49, 5  ;;  %v553_v15 = vrot.slane %v552_v7, 4  ;;  %v2511_v7 = vrot.slane %v3469_v17, 9  ;;  %v3282_v36 = vld [vmem:[%s3970_s1 + $0x168] sm:$0xff]   ;;  %v3296_v49 = vld [vmem:[%s3970_s1 + $0x198] sm:$0xff]  }
  0x30   : > { %3008 = vmatprep.subr.bf16.mxu0 %v3260_v22  ;;  %2926 = vmatprep.mubr.bf16.mxu1 %v3614_v63  ;;  %v3299_v34 = vld [vmem:[%s3970_s1 + $0xa8] sm:$0xff]  }
  0x31   : > { %2935 = vmatpush3.bf16.msra.mxu1 %v3275_v37  ;;  %v544_v18 = vsel %vm3524_vm2, %v539_v13, %v543_v3  ;;  %v558_v19 = vsel %vm3524_vm2, %v553_v15, %v557_v9  ;;  %v3274_v37 = vld [vmem:[%s3970_s1 + $0x148] sm:$0xff]   ;;  %v1643_v3 = vshrl.u32 %v3710_v2, 16  ;;  %v867_v9 = vrot.slane %v3529_v58, 5 }
  0x32   : > { %2936 = vmatprep.subr.bf16.mxu1 %v3277_v56  ;;  %v3635_v24 = vcombine.low %v544_v18, %v558_v19  ;;  %v2590_v46 = vcombine.low %v3611_v61, %v544_v18  ;;  %v3280_v61 = vld [vmem:[%s3970_s1 + $0x160] sm:$0xff]   ;;  %v1648_v58 = vrot.slane %v1646_v4, 5  ;;  %v2513_v15 = vrot.slane %v3491_v31, 9  ;;  %v3308_v4 = vld [vmem:[%s3970_s1 + $0x1c8] sm:$0xff]  }
  0x33   : > { %3009 = vmatpush3.bf16.msra.mxu0 %v3260_v22  ;;  %v1193_v22 = vrot.slane %v1191_v10, 5  ;;  %v2512_v10 = vrot.slane %v3484_v25, 9  ;;  %v1645_v13 = vrot.slane %v1643_v3, 4  ;;  %v2514_v18 = vrot.slane %v3494_v33, 9  ;;  %v3307_v3 = vld [vmem:[%s3970_s1 + $0x1c0] sm:$0xff]  }
  0x34   : > { %3010 = vmatprep.subr.bf16.mxu0 %v3262_v30  ;;  %2927 = vmatmul.mubr.bf16.gmra.mrb[4].mxu1 %v3635_v24  ;;  %v868_v40 = vsel %vm3664_vm5, %v2511_v7, %v867_v9  ;;  %v3309_v7 = vld [vmem:[%s3970_s1 + $0x1d0] sm:$0xff]   ;;  %v2645_v9 = vcombine.low %v3540_v1, %v3710_v2 }
  0x35   : > { %2937 = vmatpush3.bf16.msra.mxu1 %v3277_v56  ;;  %v1194_v29 = vor.u32 %v1193_v22, %v1190_v20  ;;  %2946 = vmatprep.mubr.bf16.mxu1 %v2496_v27  ;;  %v3278_v56 = vld [vmem:[%s3970_s1 + $0x158] sm:$0xff]   ;;  %v1649_v20 = vor.u32 %v1648_v58, %v1645_v13  ;;  %v3297_v22 = vld [vmem:[%s3970_s1 + $0xa0] sm:$0xff]   ;;  %v2679_v27 = vrot.slane %v3710_v2, 9  ;;  %v3313_v2 = vld [vmem:[%s3970_s1 + $0x1f0] sm:$0xff]  }
  0x36   : > { %2938 = vmatprep.subr.bf16.mxu1 %v3279_v12  ;;  %v3319_v13 = vld [vmem:[%s3970_s1 + $0x218] sm:$0xff]  }
  0x37   : > { %3011 = vmatpush3.bf16.msra.mxu0 %v3262_v30  ;;  %v1197_v30 = vshll.u32 %v3638_v26, 16  ;;  %v1195_v42 = vrot.slane %v1194_v29, 4  ;;  %v3323_v58 = vld [vmem:[%s3970_s1 + $0x238] sm:$0xff]  }
  0x38   : > { %3012 = vmatprep.subr.bf16.mxu0 %v3264_v55 }
  0x39   : > { %2939 = vmatpush3.bf16.msra.mxu1 %v3279_v12  ;;  %v1199_v43 = vrot.slane %v1197_v30, 5  ;;  %v856_v12 = vsel %vm3664_vm5, %v2508_v62, %v855_v59  ;;  %v2515_v30 = vrot.slane %v3537_v0, 9  ;;  %v3300_v62 = vld [vmem:[%s3970_s1 + $0x1a8] sm:$0xff]  }
  0x3a   : > { %2940 = vmatprep.subr.bf16.mxu1 %v3281_v23 }
  0x3b   : > { %3013 = vmatpush3.bf16.msra.mxu0 %v3264_v55  ;;  %v3673_v5 = vsel %vm3524_vm2, %v1195_v42, %v1199_v43  ;;  %v3687_v55 = vcombine.low %v3447_v6, %v3469_v17  ;;  %v3699_v6 = vcombine.low %v3484_v25, %v3491_v31  ;;  %v871_v17 = vrot.slane %v3551_v8, 5  ;;  %v3295_v25 = vld [vmem:[%s3970_s1 + $0x98] sm:$0xff]   ;;  %v3284_v8 = vld [vmem:[%s3970_s1 + $0x170] sm:$0xff]  }
  0x3c   : > { %3014 = vmatprep.subr.bf16.mxu0 %v3267_v11  ;;  %v2591_v54 = vcombine.low %v558_v19, %v3673_v5  ;;  %v2532_v19 = vcombine.low %v856_v12, %v860_v51  ;;  %v2600_v31 = vrot.slane %v3540_v1, 9  ;;  %v3305_v51 = vld [vmem:[%s3970_s1 + $0xb8] sm:$0xff]   ;;  %v3312_v1 = vld [vmem:[%s3970_s1 + $0x1e8] sm:$0xff]   ;;  %v3318_v12 = vld [vmem:[%s3970_s1 + $0x210] sm:$0xff]  }
  0x3d   : > { %2941 = vmatpush3.bf16.msra.mxu1 %v3281_v23  ;;  %v879_v23 = vrot.slane %v3591_v44, 5  ;;  %v3286_v44 = vld [vmem:[%s3970_s1 + $0x178] sm:$0xff]   ;;  %v872_v53 = vsel %vm3664_vm5, %v2512_v10, %v871_v17  ;;  %v3316_v10 = vld [vmem:[%s3970_s1 + $0x200] sm:$0xff]   ;;  %v3322_v17 = vld [vmem:[%s3970_s1 + $0x230] sm:$0xff]  }
  0x3e   : > { %2942 = vmatprep.subr.bf16.mxu1 %v3283_v32 }
  0x3f   : > { %3015 = vmatpush3.bf16.msra.mxu0 %v3267_v11  ;;  %v3723_v11 = vcombine.low %v3494_v33, %v3537_v0  ;;  %v1351_v33 = vrot.slane %v3638_v26, 5  ;;  %v883_v26 = vrot.slane %v3594_v45, 5  ;;  %v880_v48 = vsel %vm3664_vm5, %v2514_v18, %v879_v23  ;;  %v3327_v18 = vld [vmem:[%s3973_s4 + $0x18] sm:$0xff]   ;;  %v3332_v23 = vld [vmem:[%s3977_s8] sm:$0xff]  }
  0x40   : > { %3016 = vmatprep.subr.bf16.mxu0 %v3270_v16 }
  0x41   : > { %2943 = vmatpush3.bf16.msra.mxu1 %v3283_v32 }
  0x42   : > { %2944 = vmatprep.subr.bf16.mxu1 %v3285_v47 }
  0x43   : > { %3017 = vmatpush3.bf16.msra.mxu0 %v3270_v16  ;;  %v875_v16 = vrot.slane %v3587_v38, 5  ;;  %v427_v38 = vld [vmem:[%s3435_s28 + $0x4c] sm:$0x1] }
  0x44   : > { %3026 = vmatprep.subr.bf16.mxu0 %v3272_v28  ;;  %v1652_v29 = vshll.u32 %v427_v38, 16  ;;  %v1800_v32 = vrot.slane %v427_v38, 5 }
  0x45   : > { %2945 = vmatpush3.bf16.msra.mxu1 %v3285_v47  ;;  %v3303_v47 = vld [vmem:[%s3970_s1 + $0xb0] sm:$0xff]   ;;  %v876_v14 = vsel %vm3664_vm5, %v2513_v15, %v875_v16  ;;  %v3325_v15 = vld [vmem:[%s3973_s4 + $0x8] sm:$0xff]  }
  0x46   : > { %3019 = vmatmul.mubr.bf16.vlgmr.msra.gmra.mrb[0].mxu0 %v2589_v35  ;;  %2954 = vmatprep.subr.bf16.mxu1 %v3288_v41  ;;  %v1654_v35 = vrot.slane %v1652_v29, 5  ;;  %v3760_v0 = vsel %vm3664_vm5, %v2679_v27, %v1800_v32  ;;  %v3326_v16 = vld [vmem:[%s3973_s4 + $0x10] sm:$0xff]  }
  0x47   : > { %3027 = vmatpush3.bf16.msra.mxu0 %v3272_v28  ;;  %3022 = vmatprep.mubr.bf16.mxu0 %v2590_v46  ;;  %v1650_v28 = vrot.slane %v1649_v20, 4  ;;  %v3290_v46 = vld [vmem:[%s3970_s1 + $0x180] sm:$0xff]   ;;  %v3329_v20 = vld [vmem:[%s3973_s4 + $0x28] sm:$0xff]  }
  0x48   : > { %3028 = vmatprep.subr.bf16.mxu0 %v3274_v37  ;;  %2947 = vmatmul.mubr.bf16.vlgmr.msra.gmra.mrb[0].mxu1 %v3687_v55 }
  0x49   : > { %2955 = vmatpush3.bf16.msra.mxu1 %v3288_v41  ;;  %2950 = vmatprep.mubr.bf16.mxu1 %v3699_v6  ;;  %v1655_v42 = vsel %vm3524_vm2, %v1650_v28, %v1654_v35  ;;  %v2619_v41 = vcombine.low %v876_v14, %v880_v48 }
  0x4a   : > { %2956 = vmatprep.subr.bf16.mxu1 %v3291_v60  ;;  %v3767_v45 = vcombine.low %v3673_v5, %v1655_v42  ;;  %v3292_v5 = vld [vmem:[%s3970_s1 + $0x188] sm:$0xff]  }
  0x4b   : > { %3029 = vmatpush3.bf16.msra.mxu0 %v3274_v37  ;;  %v3756_v37 = vsel %vm3664_vm5, %v2600_v31, %v1351_v33 }
  0x4c   : > { %3030 = vmatprep.subr.bf16.mxu0 %v3276_v50  ;;  %v2696_v43 = vcombine.low %v3756_v37, %v3760_v0 }
  0x4d   : > { %2957 = vmatpush3.bf16.msra.mxu1 %v3291_v60  ;;  %v3801_v60 = vcombine.low %v872_v53, %v876_v14 }
  0x4e   : > { %3023 = vmatmul.mubr.bf16.gmra.mrb[4].mxu0 %v2591_v54  ;;  %2958 = vmatprep.subr.bf16.mxu1 %v3293_v39  ;;  %v884_v54 = vsel %vm3664_vm5, %v2515_v30, %v883_v26 }
  0x4f   : > { %3031 = vmatpush3.bf16.msra.mxu0 %v3276_v50  ;;  %3042 = vmatprep.mubr.bf16.mxu0 %v2617_v57  ;;  %v2618_v50 = vcombine.low %v868_v40, %v872_v53  ;;  %v3795_v57 = vcombine.low %v3682_v52, %v868_v40  ;;  %v2620_v59 = vcombine.low %v884_v54, %v3756_v37  ;;  %v3298_v52 = vld [vmem:[%s3970_s1 + $0x1a0] sm:$0xff]  }
  0x50   : > { %3032 = vmatprep.subr.bf16.mxu0 %v3278_v56  ;;  %2951 = vmatmul.mubr.bf16.gmra.mrb[4].mxu1 %v3723_v11  ;;  %v2706_v37 = vld [vmem:[%s3972_s3] ss:$0 sm:$0xff] }
  0x51   : > { %2959 = vmatpush3.bf16.msra.mxu1 %v3293_v39  ;;  %2970 = vmatprep.mubr.bf16.mxu1 %v2532_v19  ;;  %v3306_v39 = vld [vmem:[%s3970_s1 + $0x1b8] sm:$0xff]   ;;  %v3328_v19 = vld [vmem:[%s3973_s4 + $0x20] sm:$0xff]  }
  0x52   : > { %2960 = vmatprep.subr.bf16.mxu1 %v3295_v25 }
  0x53   : > { %3033 = vmatpush3.bf16.msra.mxu0 %v3278_v56  ;;  %v3294_v56 = vld [vmem:[%s3970_s1 + $0x190] sm:$0xff]  }
  0x54   : > { %3034 = vmatprep.subr.bf16.mxu0 %v3280_v61 }
  0x55   : > { %2961 = vmatpush3.bf16.msra.mxu1 %v3295_v25  ;;  %v3324_v25 = vld [vmem:[%s3973_s4] sm:$0xff]  }
  0x56   : > { %2962 = vmatprep.subr.bf16.mxu1 %v3297_v22 }
  0x57   : > { %3035 = vmatpush3.bf16.msra.mxu0 %v3280_v61  ;;  %v3809_v61 = vcombine.low %v880_v48, %v884_v54 }
  0x58   : > { %3036 = vmatprep.subr.bf16.mxu0 %v3282_v36 }
  0x59   : > { %2963 = vmatpush3.bf16.msra.mxu1 %v3297_v22  ;;  %v3331_v22 = vld [vmem:[%s3973_s4 + $0x38] sm:$0xff]  }
  0x5a   : > { %2964 = vmatprep.subr.bf16.mxu1 %v3299_v34 }
  0x5b   : > { %3037 = vmatpush3.bf16.msra.mxu0 %v3282_v36  ;;  %v3310_v36 = vld [vmem:[%s3970_s1 + $0x1d8] sm:$0xff]  }
  0x5c   : > { %3038 = vmatprep.subr.bf16.mxu0 %v3284_v8 }
  0x5d   : > { %2965 = vmatpush3.bf16.msra.mxu1 %v3299_v34  ;;  %v2705_v34 = vld [vmem:[%s3971_s2] ss:$0 sm:$0xff] }
  0x5e   : > { %2966 = vmatprep.subr.bf16.mxu1 %v3303_v47 }
  0x5f   : > { %3039 = vmatpush3.bf16.msra.mxu0 %v3284_v8  ;;  %v3330_v8 = vld [vmem:[%s3973_s4 + $0x30] sm:$0xff]  }
  0x60   : > { %3040 = vmatprep.subr.bf16.mxu0 %v3286_v44 }
  0x61   : > { %2967 = vmatpush3.bf16.msra.mxu1 %v3303_v47 }
  0x62   : > { %2968 = vmatprep.subr.bf16.mxu1 %v3305_v51 }
  0x63   : > { %3041 = vmatpush3.bf16.msra.mxu0 %v3286_v44 }
  0x64   : > { %3050 = vmatprep.subr.bf16.mxu0 %v3290_v46 }
  0x65   : > { %2969 = vmatpush3.bf16.msra.mxu1 %v3305_v51 }
  0x66   : > { %3043 = vmatmul.mubr.bf16.vlgmr.msra.gmra.mrb[0].mxu0 %v2618_v50  ;;  %3122 = vmatprep.subr.bf16.mxu1 %v3324_v25 }
  0x67   : > { %3051 = vmatpush3.bf16.msra.mxu0 %v3290_v46  ;;  %3046 = vmatprep.mubr.bf16.mxu0 %v2619_v41 }
  0x68   : > { %3052 = vmatprep.subr.bf16.mxu0 %v3292_v5  ;;  %2971 = vmatmul.mubr.bf16.vlgmr.msra.gmra.mrb[0].mxu1 %v3795_v57 }
  0x69   : > { %2974 = vmatprep.mubr.bf16.mxu1 %v3801_v60  ;;  %3123 = vmatpush3.bf16.msra.mxu1 %v3324_v25 }
  0x6a   : > { %3124 = vmatprep.subr.bf16.mxu1 %v3325_v15 }
  0x6b   : > { %3053 = vmatpush3.bf16.msra.mxu0 %v3292_v5 }
  0x6c   : > { %3054 = vmatprep.subr.bf16.mxu0 %v3294_v56 }
  0x6d   : > { %3125 = vmatpush3.bf16.msra.mxu1 %v3325_v15  ;;  %v3340_v15 = vld [vmem:[%s3916_s22] sm:$0xff]  }
  0x6e   : > { %3047 = vmatmul.mubr.bf16.gmra.mrb[4].mxu0 %v2620_v59  ;;  %3126 = vmatprep.subr.bf16.mxu1 %v3326_v16 }
  0x6f   : > { %3055 = vmatpush3.bf16.msra.mxu0 %v3294_v56  ;;  %3066 = vmatprep.mubr.bf16.mxu0 %v3687_v55  ;;  %v3304_v55 = vld [vmem:[%s3970_s1 + $0x1b0] sm:$0xff]  }
  0x70   : > { %3056 = vmatprep.subr.bf16.mxu0 %v3296_v49  ;;  %2975 = vmatmul.mubr.bf16.gmra.mrb[4].mxu1 %v3809_v61 }
  0x71   : > { %3127 = vmatpush3.bf16.msra.mxu1 %v3326_v16  ;;  %v3335_v16 = vld [vmem:[%s3977_s8 + $0x18] sm:$0xff]  }
  0x72   : > { %3128 = vmatprep.subr.bf16.mxu1 %v3327_v18 }
  0x73   : > { %3057 = vmatpush3.bf16.msra.mxu0 %v3296_v49 }
  0x74   : > { %3058 = vmatprep.subr.bf16.mxu0 %v3298_v52 }
  0x75   : > { %3129 = vmatpush3.bf16.msra.mxu1 %v3327_v18  ;;  %v3336_v18 = vld [vmem:[%s3977_s8 + $0x20] sm:$0xff]  }
  0x76   : > { %3130 = vmatprep.subr.bf16.mxu1 %v3328_v19 }
  0x77   : > { %3059 = vmatpush3.bf16.msra.mxu0 %v3298_v52 }
  0x78   : > { %3060 = vmatprep.subr.bf16.mxu0 %v3300_v62 }
  0x79   : > { %3131 = vmatpush3.bf16.msra.mxu1 %v3328_v19  ;;  %v3337_v19 = vld [vmem:[%s3977_s8 + $0x28] sm:$0xff]  }
  0x7a   : > { %3132 = vmatprep.subr.bf16.mxu1 %v3329_v20 }
  0x7b   : > { %3061 = vmatpush3.bf16.msra.mxu0 %v3300_v62 }
  0x7c   : > { %3062 = vmatprep.subr.bf16.mxu0 %v3304_v55 }
  0x7d   : > { %3133 = vmatpush3.bf16.msra.mxu1 %v3329_v20  ;;  %v3338_v20 = vld [vmem:[%s3977_s8 + $0x30] sm:$0xff]  }
  0x7e   : > { %3134 = vmatprep.subr.bf16.mxu1 %v3330_v8 }
  0x7f   : > { %3063 = vmatpush3.bf16.msra.mxu0 %v3304_v55 }
  0x80   : > { %3064 = vmatprep.subr.bf16.mxu0 %v3306_v39 }
  0x81   : > { %3135 = vmatpush3.bf16.msra.mxu1 %v3330_v8  ;;  %v3339_v8 = vld [vmem:[%s3977_s8 + $0x38] sm:$0xff]  }
  0x82   : > { %3136 = vmatprep.subr.bf16.mxu1 %v3331_v22 }
  0x83   : > { %3065 = vmatpush3.bf16.msra.mxu0 %v3306_v39 }
  0x84   : > { %3074 = vmatprep.subr.bf16.mxu0 %v3307_v3 }
  0x85   : > { %3137 = vmatpush3.bf16.msra.mxu1 %v3331_v22  ;;  %v3341_v22 = vld [vmem:[%s3916_s22 + $0x8] sm:$0xff]  }
  0x86   : > { %3067 = vmatmul.mubr.bf16.vlgmr.msra.gmra.mrb[0].mxu0 %v3699_v6  ;;  %v3311_v6 = vld [vmem:[%s3970_s1 + $0x1e0] sm:$0xff]   ;;  %3146 = vmatprep.subr.bf16.mxu1 %v3332_v23 }
  0x87   : > { %3075 = vmatpush3.bf16.msra.mxu0 %v3307_v3  ;;  %3070 = vmatprep.mubr.bf16.mxu0 %v3723_v11  ;;  %v3317_v11 = vld [vmem:[%s3970_s1 + $0x208] sm:$0xff]  }
  0x88   : > { %3076 = vmatprep.subr.bf16.mxu0 %v3308_v4 }
  0x8b   : > { %3077 = vmatpush3.bf16.msra.mxu0 %v3308_v4 }
  0x8c   : > { %3078 = vmatprep.subr.bf16.mxu0 %v3309_v7 }
  0x8e   : > { %3071 = vmatmul.mubr.bf16.gmra.mrb[4].mxu0 %v2645_v9 }
  0x8f   : > { %3079 = vmatpush3.bf16.msra.mxu0 %v3309_v7  ;;  %3090 = vmatprep.mubr.bf16.mxu0 %v3569_v21  ;;  %v3315_v21 = vld [vmem:[%s3970_s1 + $0x1f8] sm:$0xff]  }
  0x90   : > { %3080 = vmatprep.subr.bf16.mxu0 %v3310_v36 }
  0x93   : > { %3081 = vmatpush3.bf16.msra.mxu0 %v3310_v36 }
  0x94   : > { %3082 = vmatprep.subr.bf16.mxu0 %v3311_v6 }
  0x97   : > { %3083 = vmatpush3.bf16.msra.mxu0 %v3311_v6 }
  0x98   : > { %3084 = vmatprep.subr.bf16.mxu0 %v3312_v1 }
  0x9b   : > { %3085 = vmatpush3.bf16.msra.mxu0 %v3312_v1  ;;  %v3333_v1 = vld [vmem:[%s3977_s8 + $0x8] sm:$0xff]  }
  0x9c   : > { %3086 = vmatprep.subr.bf16.mxu0 %v3313_v2 }
  0x9f   : > { %3087 = vmatpush3.bf16.msra.mxu0 %v3313_v2 }
  0xa0   : > { %3088 = vmatprep.subr.bf16.mxu0 %v3315_v21 }
  0xa3   : > { %3089 = vmatpush3.bf16.msra.mxu0 %v3315_v21 }
  0xa4   : > { %3098 = vmatprep.subr.bf16.mxu0 %v3316_v10 }
  0xa6   : > { %3091 = vmatmul.mubr.bf16.vlgmr.msra.gmra.mrb[0].mxu0 %v3614_v63  ;;  %v3320_v63 = vld [vmem:[%s3970_s1 + $0x220] sm:$0xff]  }
  0xa7   : > { %3099 = vmatpush3.bf16.msra.mxu0 %v3316_v10  ;;  %3094 = vmatprep.mubr.bf16.mxu0 %v3635_v24  ;;  %v3321_v24 = vld [vmem:[%s3970_s1 + $0x228] sm:$0xff]  }
  0xa8   : > { %3100 = vmatprep.subr.bf16.mxu0 %v3317_v11 }
  0xab   : > { %3101 = vmatpush3.bf16.msra.mxu0 %v3317_v11 }
  0xac   : > { %3102 = vmatprep.subr.bf16.mxu0 %v3318_v12 }
  0xae   : > { %3095 = vmatmul.mubr.bf16.gmra.mrb[4].mxu0 %v3767_v45 }
  0xaf   : > { %3103 = vmatpush3.bf16.msra.mxu0 %v3318_v12  ;;  %3114 = vmatprep.mubr.bf16.mxu0 %v3795_v57 }
  0xb0   : > { %3104 = vmatprep.subr.bf16.mxu0 %v3319_v13 }
  0xb3   : > { %3105 = vmatpush3.bf16.msra.mxu0 %v3319_v13 }
  0xb4   : > { %3106 = vmatprep.subr.bf16.mxu0 %v3320_v63 }
  0xb7   : > { %3107 = vmatpush3.bf16.msra.mxu0 %v3320_v63  ;;  %v3334_v63 = vld [vmem:[%s3977_s8 + $0x10] sm:$0xff]  }
  0xb8   : > { %3108 = vmatprep.subr.bf16.mxu0 %v3321_v24 }
  0xbb   : > { %3109 = vmatpush3.bf16.msra.mxu0 %v3321_v24 }
  0xbc   : > { %3110 = vmatprep.subr.bf16.mxu0 %v3322_v17 }
  0xbf   : > { %3111 = vmatpush3.bf16.msra.mxu0 %v3322_v17 }
  0xc0   : > { %3112 = vmatprep.subr.bf16.mxu0 %v3323_v58 }
  0xc3   : > { %3113 = vmatpush3.bf16.msra.mxu0 %v3323_v58 }
  0xc6   : > { %3115 = vmatmul.mubr.bf16.vlgmr.msra.gmra.mrb[0].mxu0 %v3801_v60 }
  0xc7   : > { %3118 = vmatprep.mubr.bf16.mxu0 %v3809_v61 }
  0xce   : > { %3119 = vmatmul.mubr.bf16.gmra.mrb[4].mxu0 %v2696_v43 }
 0x13b   : > { %v2972_v31 = vpop.f32.mrb[0].mxu1 }
 0x13c   : > { %v1000_v33 = vpop.f32.mrb[1].mxu1 }
 0x13d   : > { %v2973_v38 = vpop.f32.mrb[2].mxu1 }
 0x13e   : > { %v1003_v27 = vpop.f32.mrb[3].mxu1 }
 0x143   : > { %v2976_v28 = vpop.f32.mrb[4].mxu1 }
 0x144   : > { %v1016_v29 = vpop.f32.mrb[5].mxu1 }
 0x145   : > { %v2977_v30 = vpop.f32.mrb[6].mxu1 }
 0x146   : > { %v1019_v32 = vpop.f32.mrb[7].mxu1 }
 0x199   : > { %v3116_v44 = vpop.f32.mrb[0].mxu0 }
 0x19a   : > { %v3170_v26 = vadd.f32 %v3116_v44, %v2972_v31  ;;  %v1904_v35 = vpop.f32.mrb[1].mxu0  ;;  %v3343_v31 = vld [vmem:[%s3916_s22 + $0x18] sm:$0xff]  }
 0x19b   : > { %v3171_v0 = vadd.f32 %v1904_v35, %v1000_v33  ;;  %v3117_v42 = vpop.f32.mrb[2].mxu0 }
 0x19c   : > { %v1952_v43 = vmul.f32 %v3170_v26, %v2705_v34  ;;  %v3172_v45 = vadd.f32 %v3117_v42, %v2973_v38  ;;  %v1907_v46 = vpop.f32.mrb[3].mxu0  ;;  %v2729_v26 = vld [vmem:[%s3978_s9] ss:$0 sm:$0xff] }
 0x19d   : > { %v1950_v47 = vmul.f32 %v3171_v0, %v2705_v34  ;;  %v3173_v40 = vadd.f32 %v1907_v46, %v1003_v27 }
 0x19e   : > { %v1967_v53 = vadd.f32 %v2706_v37, %v1952_v43  ;;  %v1953_v14 = vmul.f32 %v3172_v45, %v2705_v34  ;;  %v2730_v43 = vld [vmem:[%s3979_s10] ss:$0 sm:$0xff] }
 0x19f   : > { %v1965_v48 = vadd.f32 %v2706_v37, %v1950_v47  ;;  %v1951_v50 = vmul.f32 %v3173_v40, %v2705_v34 }
 0x1a0   : > { %v1968_v5 = vadd.f32 %v2706_v37, %v1953_v14  ;;  %v1975_v54 = vmax.f32 %v1967_v53, 0.0 }
 0x1a1   : > { %v1966_v41 = vadd.f32 %v2706_v37, %v1951_v50  ;;  %v3120_v51 = vpop.f32.mrb[4].mxu0  ;;  %v1973_v49 = vmax.f32 %v1965_v48, 0.0 }
 0x1a2   : > { %v1976_v56 = vmax.f32 %v1968_v5, 0.0  ;;  %v3174_v57 = vadd.f32 %v3120_v51, %v2976_v28  ;;  %v1920_v59 = vpop.f32.mrb[5].mxu0 }
 0x1a3   : > { %v1974_v60 = vmax.f32 %v1966_v41, 0.0  ;;  %v3175_v52 = vadd.f32 %v1920_v59, %v1016_v29  ;;  %v3121_v61 = vpop.f32.mrb[6].mxu0 }
 0x1a4   : > { %v1982_v62 = vpack.c.bf16 %v1976_v56, %v1975_v54  ;;  %v1956_v55 = vmul.f32 %v3174_v57, %v2705_v34  ;;  %v3176_v39 = vadd.f32 %v3121_v61, %v2977_v30  ;;  %v1923_v3 = vpop.f32.mrb[7].mxu0 }
 0x1a5   : > { %v1954_v4 = vmul.f32 %v3175_v52, %v2705_v34  ;;  %v3177_v7 = vadd.f32 %v1923_v3, %v1019_v32  ;;  %v1981_v9 = vpack.c.bf16 %v1974_v60, %v1973_v49 }
 0x1a6   : > { %v1971_v36 = vadd.f32 %v2706_v37, %v1956_v55  ;;  %v1957_v6 = vmul.f32 %v3176_v39, %v2705_v34 }
 0x1a7   : > { %v1969_v2 = vadd.f32 %v2706_v37, %v1954_v4  ;;  %v1955_v21 = vmul.f32 %v3177_v7, %v2705_v34  ;;  %3138 = vmatprep.mubr.bf16.mxu1 %v1981_v9  ;;  %v2715_v34 = vld [vmem:[%s3974_s5] ss:$0 sm:$0xff] }
 0x1a8   : > { %v1972_v10 = vadd.f32 %v2706_v37, %v1957_v6  ;;  %3139 = vmatmul.mubr.bf16.vlgmr.msra.gmra.mrb[8].mxu1 %v1982_v62  ;;  %v1979_v12 = vmax.f32 %v1971_v36, 0.0 }
 0x1a9   : > { %v1970_v11 = vadd.f32 %v2706_v37, %v1955_v21  ;;  %3147 = vmatpush3.bf16.msra.mxu1 %v3332_v23  ;;  %v1977_v24 = vmax.f32 %v1969_v2, 0.0  ;;  %v3342_v23 = vld [vmem:[%s3916_s22 + $0x10] sm:$0xff]   ;;  %v2716_v37 = vld [vmem:[%s3975_s6] ss:$0 sm:$0xff] }
 0x1aa   : > { %v1980_v13 = vmax.f32 %v1972_v10, 0.0  ;;  %3148 = vmatprep.subr.bf16.mxu1 %v3333_v1 }
 0x1ab   : > { %v1978_v17 = vmax.f32 %v1970_v11, 0.0 }
 0x1ac   : > { %v1984_v58 = vpack.c.bf16 %v1980_v13, %v1979_v12 }
 0x1ad   : > { %3149 = vmatpush3.bf16.msra.mxu1 %v3333_v1  ;;  %v1983_v25 = vpack.c.bf16 %v1978_v17, %v1977_v24 }
 0x1ae   : > { %3150 = vmatprep.subr.bf16.mxu1 %v3334_v63 }
 0x1af   : > { %3142 = vmatprep.mubr.bf16.mxu1 %v1983_v25 }
 0x1b0   : > { %3143 = vmatmul.mubr.bf16.gmra.mrb[12].mxu1 %v1984_v58 }
 0x1b1   : > { %3151 = vmatpush3.bf16.msra.mxu1 %v3334_v63  ;;  %3162 = vmatprep.mubr.bf16.mxu1 %v3340_v15 }
 0x1b2   : > { %3152 = vmatprep.subr.bf16.mxu1 %v3335_v16 }
 0x1b5   : > { %3153 = vmatpush3.bf16.msra.mxu1 %v3335_v16 }
 0x1b6   : > { %3154 = vmatprep.subr.bf16.mxu1 %v3336_v18 }
 0x1b9   : > { %3155 = vmatpush3.bf16.msra.mxu1 %v3336_v18 }
 0x1ba   : > { %3156 = vmatprep.subr.bf16.mxu1 %v3337_v19 }
 0x1bd   : > { %3157 = vmatpush3.bf16.msra.mxu1 %v3337_v19 }
 0x1be   : > { %3158 = vmatprep.subr.bf16.mxu1 %v3338_v20 }
 0x1c1   : > { %3159 = vmatpush3.bf16.msra.mxu1 %v3338_v20 }
 0x1c2   : > { %3160 = vmatprep.subr.bf16.mxu1 %v3339_v8 }
 0x1c5   : > { %3161 = vmatpush3.bf16.msra.mxu1 %v3339_v8 }
 0x1c8   : > { %3163 = vmatmul.mubr.bf16.vlgmr.msra.gmra.mrb[16].mxu1 %v3341_v22 }
 0x1c9   : > { %3166 = vmatprep.mubr.bf16.mxu1 %v3342_v23 }
 0x1d0   : > { %3167 = vmatmul.mubr.bf16.gmra.mrb[20].mxu1 %v3343_v31 }
 0x27b   : > { %v3140_v33 = vpop.f32.mrb[8].mxu1 }
 0x27c   : > { %v2083_v38 = vpop.f32.mrb[9].mxu1  ;;  %v2123_v35 = vmul.f32 %v3140_v33, %v2715_v34 }
 0x27d   : > { %v3141_v27 = vpop.f32.mrb[10].mxu1  ;;  %v2121_v0 = vmul.f32 %v2715_v34, %v2083_v38 }
 0x27e   : > { %v2086_v28 = vpop.f32.mrb[11].mxu1  ;;  %v2124_v45 = vmul.f32 %v3141_v27, %v2715_v34  ;;  %v2138_v48 = vadd.f32 %v2716_v37, %v2123_v35 }
 0x27f   : > { %v2122_v40 = vmul.f32 %v2715_v34, %v2086_v28  ;;  %v2136_v51 = vadd.f32 %v2716_v37, %v2121_v0 }
 0x280   : > { %v2139_v57 = vadd.f32 %v2716_v37, %v2124_v45 }
 0x281   : > { %v2137_v60 = vadd.f32 %v2716_v37, %v2122_v40 }
 0x283   : > { %v3144_v29 = vpop.f32.mrb[12].mxu1 }
 0x284   : > { %v2099_v30 = vpop.f32.mrb[13].mxu1  ;;  %v2127_v62 = vmul.f32 %v3144_v29, %v2715_v34 }
 0x285   : > { %v3145_v32 = vpop.f32.mrb[14].mxu1  ;;  %v2125_v39 = vmul.f32 %v2715_v34, %v2099_v30 }
 0x286   : > { %v2102_v44 = vpop.f32.mrb[15].mxu1  ;;  %v2128_v7 = vmul.f32 %v3145_v32, %v2715_v34  ;;  %v2142_v13 = vadd.f32 %v2716_v37, %v2127_v62 }
 0x287   : > { %v2126_v2 = vmul.f32 %v2715_v34, %v2102_v44  ;;  %v2140_v25 = vadd.f32 %v2716_v37, %v2125_v39 }
 0x288   : > { %v2143_v19 = vadd.f32 %v2716_v37, %v2128_v7 }
 0x289   : > { %v2141_v22 = vadd.f32 %v2716_v37, %v2126_v2 }
 0x29b   : > { %v3164_v42 = vpop.f32.mrb[16].mxu1 }
 0x29c   : > { %v2314_v46 = vmul.f32 %v3164_v42, %v2729_v26  ;;  %v2274_v47 = vpop.f32.mrb[17].mxu1 }
 0x29d   : > { %v2312_v53 = vmul.f32 %v2729_v26, %v2274_v47  ;;  %v3165_v14 = vpop.f32.mrb[18].mxu1 }
 0x29e   : > { %v2329_v50 = vadd.f32 %v2730_v43, %v2314_v46  ;;  %v2315_v5 = vmul.f32 %v3165_v14, %v2729_v26  ;;  %v2277_v41 = vpop.f32.mrb[19].mxu1 }
 0x29f   : > { %v2327_v54 = vadd.f32 %v2730_v43, %v2312_v53  ;;  %v2313_v56 = vmul.f32 %v2729_v26, %v2277_v41 }
 0x2a0   : > { %v2337_v59 = vadd.f32 %v2329_v50, %v2138_v48  ;;  %v2330_v49 = vadd.f32 %v2730_v43, %v2315_v5 }
 0x2a1   : > { %v2335_v52 = vadd.f32 %v2327_v54, %v2136_v51  ;;  %v2328_v61 = vadd.f32 %v2730_v43, %v2313_v56 }
 0x2a2   : > { %v2338_v55 = vadd.f32 %v2330_v49, %v2139_v57  ;;  %v2345_v9 = vmax.f32 %v2337_v59, 0.0 }
 0x2a3   : > { %v2336_v3 = vadd.f32 %v2328_v61, %v2137_v60  ;;  %v3168_v4 = vpop.f32.mrb[20].mxu1  ;;  %v2343_v21 = vmax.f32 %v2335_v52, 0.0 }
 0x2a4   : > { %v2346_v36 = vmax.f32 %v2338_v55, 0.0  ;;  %v2318_v6 = vmul.f32 %v3168_v4, %v2729_v26  ;;  %v2290_v1 = vpop.f32.mrb[21].mxu1 }
 0x2a5   : > { %v2344_v10 = vmax.f32 %v2336_v3, 0.0  ;;  %v2316_v11 = vmul.f32 %v2729_v26, %v2290_v1  ;;  %v3169_v12 = vpop.f32.mrb[22].mxu1 }
 0x2a6   : > { %v2759_v63 = vpack.c.bf16 %v2346_v36, %v2345_v9  ;;  %v2333_v24 = vadd.f32 %v2730_v43, %v2318_v6  ;;  %v2319_v17 = vmul.f32 %v3169_v12, %v2729_v26  ;;  %v2293_v58 = vpop.f32.mrb[23].mxu1 }
 0x2a7   : > { %v2754_v15 = vpack.c.bf16 %v2344_v10, %v2343_v21  ;;  %v2331_v16 = vadd.f32 %v2730_v43, %v2316_v11  ;;  %v2317_v18 = vmul.f32 %v2729_v26, %v2293_v58 }
 0x2a8   : > { %2771 = vst [vmem:[%s406_s16 + $0x8] sm:$0xff] %v2759_v63   ;;  %v2341_v20 = vadd.f32 %v2333_v24, %v2142_v13  ;;  %v2334_v8 = vadd.f32 %v2730_v43, %v2319_v17 }
 0x2a9   : > { %2755 = vst [vmem:[%s406_s16] sm:$0xff] %v2754_v15   ;;  %v2339_v23 = vadd.f32 %v2331_v16, %v2140_v25  ;;  %v2332_v31 = vadd.f32 %v2730_v43, %v2317_v18 }
 0x2aa   : > { %v2342_v33 = vadd.f32 %v2334_v8, %v2143_v19  ;;  %v2349_v27 = vmax.f32 %v2341_v20, 0.0 }
 0x2ab   : > { %v2340_v38 = vadd.f32 %v2332_v31, %v2141_v22  ;;  %v2347_v29 = vmax.f32 %v2339_v23, 0.0 }
 0x2ac   : > { %v2350_v28 = vmax.f32 %v2342_v33, 0.0 }
 0x2ad   : > { %v2348_v30 = vmax.f32 %v2340_v38, 0.0 }
 0x2ae   : > { %v2769_v32 = vpack.c.bf16 %v2350_v28, %v2349_v27 }
 0x2af   : > { %v2764_v44 = vpack.c.bf16 %v2348_v30, %v2347_v29 }
 0x2b0   : > { %2773 = vst [vmem:[%s406_s16 + $0x18] sm:$0xff] %v2769_v32  }
 0x2b1   : > { %2772 = vst [vmem:[%s406_s16 + $0x10] sm:$0xff] %v2764_v44  }
 0x2b2 PF: > { %s21_s17 = sadd.s32 1, %s3350_s17  }
 0x2b3   : > { %p18_p4 = scmp.ge.s32.totalorder %s21_s17, 4  }
 0x2b5   :  { %20 = sbr.rel (!%p18_p4) target bundleno = 1 (0x1), region = 105 }

</bundles_post_ra>
